<compile_context>
chip_gen: v7x
topology: tpu7x:2x2x1
jax: 0.10.0
libtpu: 0.0.40
codegen_flags: <defaults>
</compile_context>

<pallas_src>
import functools

import jax
import jax.numpy as jnp
from jax.experimental import pallas as pl
from jax.experimental.pallas import tpu as pltpu


def _align(x, m):
    return ((x + m - 1) // m) * m


# --------------------------------------------------------------------------
# Pallas kernel 1: fused  O = act(A @ B + bias), tiled over M.
#   A tile: (TM, Kp) bf16   B: (Kp, Np) bf16 (resident)   bias: (1, Np) f32
# --------------------------------------------------------------------------
def _matmul_bias_act_kernel(a_ref, b_ref, bias_ref, o_ref, *, relu):
    acc = jnp.dot(a_ref[...], b_ref[...], preferred_element_type=jnp.float32)
    acc = acc + bias_ref[...]                       # (1, Np) broadcast over rows
    if relu:
        acc = jnp.maximum(acc, 0.0)
    o_ref[...] = acc.astype(o_ref.dtype)


def _choose_tm(m, target=256):
    """Pick an M-tile <= target that is a multiple of 8 and covers m with
    minimal zero padding."""
    n_tiles = max(1, -(-m // target))
    tm = _align(-(-m // n_tiles), 8)
    return tm, tm * n_tiles


def matmul_bias_act(a, b, bias, *, relu):
    """a: (M, K), b: (K, N), bias: (N,) -> (M, N) float32.

    - M is tiled (grid axis marked "parallel" -> megacore / 2-TC sharding,
      BlockSpec double-buffering overlaps the A-tile DMA with the MXU).
    - K and N are zero-padded to multiples of 128 (MXU fill, lane-dense vst).
    - A and B are fed to the MXU in bf16; accumulation / bias / output in f32.
    """
    M, K = a.shape
    Kb, N = b.shape
    assert K == Kb
    K_pad = _align(K, 128)
    N_pad = _align(N, 128)
    TM, M_pad = _choose_tm(M)

    a_p = jnp.pad(a.astype(jnp.float32),
                  ((0, M_pad - M), (0, K_pad - K))).astype(jnp.bfloat16)
    b_p = jnp.pad(b.astype(jnp.float32),
                  ((0, K_pad - K), (0, N_pad - N))).astype(jnp.bfloat16)
    bias_p = jnp.pad(bias.astype(jnp.float32),
                     (0, N_pad - N)).reshape(1, N_pad)

    out = pl.pallas_call(
        functools.partial(_matmul_bias_act_kernel, relu=relu),
        out_shape=jax.ShapeDtypeStruct((M_pad, N_pad), jnp.float32),
        grid=(M_pad // TM,),
        in_specs=[
            pl.BlockSpec((TM, K_pad), lambda i: (i, 0)),      # streamed A tiles
            pl.BlockSpec((K_pad, N_pad), lambda i: (0, 0)),   # resident weights
            pl.BlockSpec((1, N_pad), lambda i: (0, 0)),       # resident bias
        ],
        out_specs=pl.BlockSpec((TM, N_pad), lambda i: (i, 0)),
        compiler_params=pltpu.CompilerParams(
            dimension_semantics=("parallel",),
            # Tiles are small; cap well under v7x's 64 MiB physical VMEM.
            vmem_limit_bytes=48 * 1024 * 1024,
        ),
    )(a_p, b_p, bias_p)
    return out[:M, :N]


# --------------------------------------------------------------------------
# Pallas kernel 2: LSTM recurrence (batch_first), returns last hidden state.
# The input projection (x @ W_ih^T + b) is precomputed by the GEMM kernel and
# streamed in as gx (T, B, 4H); only h @ W_hh^T runs per step.  h/c live in
# VMEM scratch across the sequential grid=(T,) loop; output written once.
# --------------------------------------------------------------------------
def _lstm_kernel(gx_ref, whh_ref, h_out_ref, h_scr, c_scr):
    t = pl.program_id(0)

    @pl.when(t == 0)
    def _():
        h_scr[...] = jnp.zeros_like(h_scr)
        c_scr[...] = jnp.zeros_like(c_scr)

    H = h_scr.shape[1]
    # Recurrent matmul on the MXU (bf16 operands, f32 accumulate);
    # gate math stays in f32 (v5e has no bf16 VPU/EUP).
    gates = gx_ref[0] + jnp.dot(h_scr[...].astype(jnp.bfloat16), whh_ref[...],
                                preferred_element_type=jnp.float32)   # (B, 4H)
    i_g = jax.nn.sigmoid(gates[:, 0:H])          # PyTorch gate order: i, f, g, o
    f_g = jax.nn.sigmoid(gates[:, H:2 * H])
    g_g = jnp.tanh(gates[:, 2 * H:3 * H])
    o_g = jax.nn.sigmoid(gates[:, 3 * H:4 * H])
    c = f_g * c_scr[...] + i_g * g_g
    h = o_g * jnp.tanh(c)
    c_scr[...] = c
    h_scr[...] = h

    @pl.when(t == pl.num_programs(0) - 1)
    def _():
        h_out_ref[...] = h


def lstm_last_hidden(x_tbf, w_ih, w_hh, b_ih, b_hh):
    """x_tbf: (T, B, D).  w_ih/w_hh: (4H, D)/(4H, H) in PyTorch layout."""
    T, B, D = x_tbf.shape
    H = w_hh.shape[1]
    # Hoisted input projection: one big GEMM over M = T*B instead of T tiny
    # per-step matmuls inside the sequential loop.
    gx = matmul_bias_act(x_tbf.reshape(T * B, D),
                         jnp.transpose(w_ih),           # (D, 4H)
                         b_ih + b_hh, relu=False)       # (T*B, 4H) f32
    gx = gx.reshape(T, B, 4 * H)
    whh_t = jnp.transpose(w_hh).astype(jnp.bfloat16)    # (H, 4H)

    return pl.pallas_call(
        _lstm_kernel,
        out_shape=jax.ShapeDtypeStruct((B, H), jnp.float32),
        grid=(T,),
        in_specs=[
            pl.BlockSpec((1, B, 4 * H), lambda t: (t, 0, 0)),
            pl.BlockSpec((H, 4 * H), lambda t: (0, 0)),
        ],
        out_specs=pl.BlockSpec((B, H), lambda t: (0, 0)),
        scratch_shapes=[pltpu.VMEM((B, H), jnp.float32),
                        pltpu.VMEM((B, H), jnp.float32)],
        compiler_params=pltpu.CompilerParams(
            dimension_semantics=("arbitrary",)),
    )(gx, whh_t)


# --------------------------------------------------------------------------
# JAX glue: im2col, max-pool, batchnorm (eval), shape plumbing
# --------------------------------------------------------------------------
def conv2d_relu(x_nhwc, w_oihw, b, pad, *, relu=True):
    """'same'-style conv with explicit zero padding, via im2col + Pallas GEMM."""
    # TODO(synk): replace im2col with an in-kernel KH*KW reduction (direct conv)
    # to avoid materializing the 9x-35x patch tensor in HBM at larger shapes.
    Cout, Cin, KH, KW = w_oihw.shape
    ph, pw = pad
    B, H, W, _ = x_nhwc.shape
    xp = jnp.pad(x_nhwc, ((0, 0), (ph, ph), (pw, pw), (0, 0)))
    cols = []
    for kh in range(KH):
        for kw in range(KW):
            cols.append(xp[:, kh:kh + H, kw:kw + W, :])
    patches = jnp.concatenate(cols, axis=-1)                 # (B,H,W,KH*KW*Cin)
    a = patches.reshape(B * H * W, KH * KW * Cin)
    w_mat = jnp.transpose(w_oihw, (2, 3, 1, 0)).reshape(KH * KW * Cin, Cout)
    out = matmul_bias_act(a, w_mat, b, relu=relu)
    return out.reshape(B, H, W, Cout)


def maxpool_nhwc(x, ph, pw):
    # TODO(synk): fuse the 2x3 window max into the conv GEMM epilogue to save
    # one HBM round trip per pool.
    B, H, W, C = x.shape
    x = x[:, :(H // ph) * ph, :(W // pw) * pw, :]
    x = x.reshape(B, H // ph, ph, W // pw, pw, C)
    return jnp.max(x, axis=(2, 4))


def forward(x_nchw, p):
    eps = 1e-5
    # BatchNorm2d(3) in eval mode (running stats) -> per-channel affine.
    # NOTE: not folded into conv1 weights because conv1 zero-pads the BN
    # *output*; folding the shift into the conv bias would change border
    # pixels.  This affine is a tiny fused elementwise op on the raw input.
    scale = p["bn_gamma"] / jnp.sqrt(p["bn_var"] + eps)
    shift = p["bn_beta"] - p["bn_mean"] * scale

    x = jnp.transpose(x_nchw, (0, 2, 3, 1)).astype(jnp.float32)   # NCHW -> NHWC
    x = x * scale[None, None, None, :] + shift[None, None, None, :]

    x = conv2d_relu(x, p["w1"], p["b1"], (2, 3))      # Conv(3->64, (5,7)) + ReLU
    x = maxpool_nhwc(x, 2, 3)
    x = conv2d_relu(x, p["w2"], p["b2"], (1, 1))      # Conv(64->64, 3x3) + ReLU
    x = conv2d_relu(x, p["w3"], p["b3"], (1, 1))      # Conv(64->64, 3x3) + ReLU
    x = maxpool_nhwc(x, 2, 3)
    x = conv2d_relu(x, p["w4"], p["b4"], (1, 1))      # Conv(64->128, 3x3) + ReLU
    x = conv2d_relu(x, p["w5"], p["b5"], (1, 1))      # Conv(128->128, 3x3) + ReLU
    x = maxpool_nhwc(x, 2, 3)                         # (B, H', W', 128)

    # permute(0,3,1,2).mean(dim=3) on NCHW == mean over H in NHWC -> (B, W', 128)
    seq = jnp.mean(x, axis=1)

    # LSTM(128 -> 128), batch_first; we only need output[:, -1, :]
    x_tbf = jnp.transpose(seq, (1, 0, 2))             # (T, B, 128)
    last = lstm_last_hidden(x_tbf, p["w_ih"], p["w_hh"], p["b_ih"], p["b_hh"])

    # fc: Linear(128 -> num_classes)
    logits = matmul_bias_act(last, jnp.transpose(p["fc_w"]), p["fc_b"],
                             relu=False)
    return logits


# --------------------------------------------------------------------------
# Deterministic parameter initialization (synthetic; matches PyTorch shapes)
# --------------------------------------------------------------------------
def init_params(key, num_classes=3, hidden=128):
    ks = jax.random.split(key, 16)

    def w(k, shape, s=0.05):
        return s * jax.random.normal(k, shape, jnp.float32)

    return {
        "bn_gamma": jnp.ones((3,), jnp.float32),
        "bn_beta": jnp.zeros((3,), jnp.float32),
        "bn_mean": jnp.zeros((3,), jnp.float32),
        "bn_var": jnp.ones((3,), jnp.float32),
        "w1": w(ks[0], (64, 3, 5, 7)),    "b1": w(ks[1], (64,)),
        "w2": w(ks[2], (64, 64, 3, 3)),   "b2": w(ks[3], (64,)),
        "w3": w(ks[4], (64, 64, 3, 3)),   "b3": w(ks[5], (64,)),
        "w4": w(ks[6], (128, 64, 3, 3)),  "b4": w(ks[7], (128,)),
        "w5": w(ks[8], (128, 128, 3, 3)), "b5": w(ks[9], (128,)),
        "w_ih": w(ks[10], (4 * hidden, hidden)),
        "w_hh": w(ks[11], (4 * hidden, hidden)),
        "b_ih": w(ks[12], (4 * hidden,)),
        "b_hh": w(ks[13], (4 * hidden,)),
        "fc_w": w(ks[14], (num_classes, hidden)),
        "fc_b": w(ks[15], (num_classes,)),
    }


if __name__ == "__main__":
    key = jax.random.PRNGKey(0)
    k_x, k_p = jax.random.split(key)

    # Small NCHW input: W=54 so the three MaxPool2d((2,3)) give seq_len T=2.
    B, C, H, W = 2, 3, 16, 54
    x = jax.random.normal(k_x, (B, C, H, W), jnp.float32)
    params = init_params(k_p, num_classes=3, hidden=128)

    out = jax.jit(forward)(x, params)
    out = jax.block_until_ready(out)
    assert out.shape == (B, 3) and out.dtype == jnp.float32
    print("KERNEL_OK")
</pallas_src>

<mosaic_0001>
module attributes {stable_mosaic.version = 11 : i64} {
  func.func @_matmul_bias_act_kernel(%arg0: i32, %arg1: memref<248x128xbf16, #tpu.memory_space<vmem>>, %arg2: memref<128x128xbf16, #tpu.memory_space<vmem>>, %arg3: memref<1x128xf32, #tpu.memory_space<vmem>>, %arg4: memref<248x128xf32, #tpu.memory_space<vmem>>) attributes {dimension_semantics = [#tpu.dimension_semantics<parallel>], iteration_bounds = array<i64: 7>, scalar_prefetch = 0 : i64, scratch_operands = 0 : i64, tpu.core_type = #tpu.core_type<tc>, window_params = [{transform_indices = @transform_0, window_bounds = array<i64: 248, 128>}, {pipeline_mode = #tpu.pipeline_mode<synchronous>, transform_indices = @transform_1, window_bounds = array<i64: 128, 128>}, {pipeline_mode = #tpu.pipeline_mode<synchronous>, transform_indices = @transform_2, window_bounds = array<i64: 1, 128>}, {transform_indices = @transform_3, window_bounds = array<i64: 248, 128>}]} {
    %c0 = arith.constant 0 : index
    %c0_0 = arith.constant 0 : index
    %0 = vector.load %arg1[%c0, %c0_0] : memref<248x128xbf16, #tpu.memory_space<vmem>>, vector<248x128xbf16>
    %c0_1 = arith.constant 0 : index
    %c0_2 = arith.constant 0 : index
    %1 = vector.load %arg2[%c0_1, %c0_2] : memref<128x128xbf16, #tpu.memory_space<vmem>>, vector<128x128xbf16>
    %cst = arith.constant dense<0.000000e+00> : vector<248x128xf32>
    %2 = tpu.matmul %0, %1, %cst {dimension_numbers = #tpu.dot_dimension_numbers<[1], [0], [0], [1], [0, 0, 1, 1], [], []>} : vector<248x128xbf16>, vector<128x128xbf16>, vector<248x128xf32> -> vector<248x128xf32>
    %c0_3 = arith.constant 0 : index
    %c0_4 = arith.constant 0 : index
    %3 = vector.load %arg3[%c0_3, %c0_4] : memref<1x128xf32, #tpu.memory_space<vmem>>, vector<1x128xf32>
    %4 = vector.broadcast %3 : vector<1x128xf32> to vector<248x128xf32>
    %5 = arith.addf %2, %4 : vector<248x128xf32>
    %cst_5 = arith.constant 0.000000e+00 : f32
    %6 = vector.broadcast %cst_5 : f32 to vector<248x128xf32>
    %7 = arith.maximumf %5, %6 : vector<248x128xf32>
    %c0_6 = arith.constant 0 : index
    %c0_7 = arith.constant 0 : index
    %8 = vector.load %arg4[%c0_6, %c0_7] : memref<248x128xf32, #tpu.memory_space<vmem>>, vector<248x128xf32>
    tpu.vector_store %arg4[%c0_6, %c0_7], %7 {strides = array<i32>} : memref<248x128xf32, #tpu.memory_space<vmem>>, vector<248x128xf32>,
    return
  }
  func.func @transform_0(%arg0: i32) -> (i32, i32) {
    %c0_i32 = arith.constant 0 : i32
    %c0_i32_0 = arith.constant 0 : i32
    return %arg0, %c0_i32 : i32, i32
  }
  func.func @transform_1(%arg0: i32) -> (i32, i32) {
    %c0_i32 = arith.constant 0 : i32
    %c0_i32_0 = arith.constant 0 : i32
    %c0_i32_1 = arith.constant 0 : i32
    return %c0_i32, %c0_i32_0 : i32, i32
  }
  func.func @transform_2(%arg0: i32) -> (i32, i32) {
    %c0_i32 = arith.constant 0 : i32
    %c0_i32_0 = arith.constant 0 : i32
    %c0_i32_1 = arith.constant 0 : i32
    return %c0_i32, %c0_i32_0 : i32, i32
  }
  func.func @transform_3(%arg0: i32) -> (i32, i32) {
    %c0_i32 = arith.constant 0 : i32
    %c0_i32_0 = arith.constant 0 : i32
    return %arg0, %c0_i32 : i32, i32
  }
}

module attributes {stable_mosaic.version = 11 : i64} {
  func.func @_matmul_bias_act_kernel(%arg0: i32, %arg1: memref<144x640xbf16, #tpu.memory_space<vmem>>, %arg2: memref<640x128xbf16, #tpu.memory_space<vmem>>, %arg3: memref<1x128xf32, #tpu.memory_space<vmem>>, %arg4: memref<144x128xf32, #tpu.memory_space<vmem>>) attributes {dimension_semantics = [#tpu.dimension_semantics<parallel>], iteration_bounds = array<i64: 2>, scalar_prefetch = 0 : i64, scratch_operands = 0 : i64, tpu.core_type = #tpu.core_type<tc>, window_params = [{transform_indices = @transform_0, window_bounds = array<i64: 144, 640>}, {pipeline_mode = #tpu.pipeline_mode<synchronous>, transform_indices = @transform_1, window_bounds = array<i64: 640, 128>}, {pipeline_mode = #tpu.pipeline_mode<synchronous>, transform_indices = @transform_2, window_bounds = array<i64: 1, 128>}, {transform_indices = @transform_3, window_bounds = array<i64: 144, 128>}]} {
    %c0 = arith.constant 0 : index
    %c0_0 = arith.constant 0 : index
    %0 = vector.load %arg1[%c0, %c0_0] : memref<144x640xbf16, #tpu.memory_space<vmem>>, vector<144x640xbf16>
    %c0_1 = arith.constant 0 : index
    %c0_2 = arith.constant 0 : index
    %1 = vector.load %arg2[%c0_1, %c0_2] : memref<640x128xbf16, #tpu.memory_space<vmem>>, vector<640x128xbf16>
    %cst = arith.constant dense<0.000000e+00> : vector<144x128xf32>
    %2 = tpu.matmul %0, %1, %cst {dimension_numbers = #tpu.dot_dimension_numbers<[1], [0], [0], [1], [0, 0, 1, 1], [], []>} : vector<144x640xbf16>, vector<640x128xbf16>, vector<144x128xf32> -> vector<144x128xf32>
    %c0_3 = arith.constant 0 : index
    %c0_4 = arith.constant 0 : index
    %3 = vector.load %arg3[%c0_3, %c0_4] : memref<1x128xf32, #tpu.memory_space<vmem>>, vector<1x128xf32>
    %4 = vector.broadcast %3 : vector<1x128xf32> to vector<144x128xf32>
    %5 = arith.addf %2, %4 : vector<144x128xf32>
    %cst_5 = arith.constant 0.000000e+00 : f32
    %6 = vector.broadcast %cst_5 : f32 to vector<144x128xf32>
    %7 = arith.maximumf %5, %6 : vector<144x128xf32>
    %c0_6 = arith.constant 0 : index
    %c0_7 = arith.constant 0 : index
    %8 = vector.load %arg4[%c0_6, %c0_7] : memref<144x128xf32, #tpu.memory_space<vmem>>, vector<144x128xf32>
    tpu.vector_store %arg4[%c0_6, %c0_7], %7 {strides = array<i32>} : memref<144x128xf32, #tpu.memory_space<vmem>>, vector<144x128xf32>,
    return
  }
  func.func @transform_0(%arg0: i32) -> (i32, i32) {
    %c0_i32 = arith.constant 0 : i32
    %c0_i32_0 = arith.constant 0 : i32
    return %arg0, %c0_i32 : i32, i32
  }
  func.func @transform_1(%arg0: i32) -> (i32, i32) {
    %c0_i32 = arith.constant 0 : i32
    %c0_i32_0 = arith.constant 0 : i32
    %c0_i32_1 = arith.constant 0 : i32
    return %c0_i32, %c0_i32_0 : i32, i32
  }
  func.func @transform_2(%arg0: i32) -> (i32, i32) {
    %c0_i32 = arith.constant 0 : i32
    %c0_i32_0 = arith.constant 0 : i32
    %c0_i32_1 = arith.constant 0 : i32
    return %c0_i32, %c0_i32_0 : i32, i32
  }
  func.func @transform_3(%arg0: i32) -> (i32, i32) {
    %c0_i32 = arith.constant 0 : i32
    %c0_i32_0 = arith.constant 0 : i32
    return %arg0, %c0_i32 : i32, i32
  }
}

module attributes {stable_mosaic.version = 11 : i64} {
  func.func @_matmul_bias_act_kernel(%arg0: i32, %arg1: memref<48x640xbf16, #tpu.memory_space<vmem>>, %arg2: memref<640x128xbf16, #tpu.memory_space<vmem>>, %arg3: memref<1x128xf32, #tpu.memory_space<vmem>>, %arg4: memref<48x128xf32, #tpu.memory_space<vmem>>) attributes {dimension_semantics = [#tpu.dimension_semantics<parallel>], iteration_bounds = array<i64: 1>, scalar_prefetch = 0 : i64, scratch_operands = 0 : i64, tpu.core_type = #tpu.core_type<tc>, window_params = [{transform_indices = @transform_0, window_bounds = array<i64: 48, 640>}, {pipeline_mode = #tpu.pipeline_mode<synchronous>, transform_indices = @transform_1, window_bounds = array<i64: 640, 128>}, {pipeline_mode = #tpu.pipeline_mode<synchronous>, transform_indices = @transform_2, window_bounds = array<i64: 1, 128>}, {transform_indices = @transform_3, window_bounds = array<i64: 48, 128>}]} {
    %c0 = arith.constant 0 : index
    %c0_0 = arith.constant 0 : index
    %0 = vector.load %arg1[%c0, %c0_0] : memref<48x640xbf16, #tpu.memory_space<vmem>>, vector<48x640xbf16>
    %c0_1 = arith.constant 0 : index
    %c0_2 = arith.constant 0 : index
    %1 = vector.load %arg2[%c0_1, %c0_2] : memref<640x128xbf16, #tpu.memory_space<vmem>>, vector<640x128xbf16>
    %cst = arith.constant dense<0.000000e+00> : vector<48x128xf32>
    %2 = tpu.matmul %0, %1, %cst {dimension_numbers = #tpu.dot_dimension_numbers<[1], [0], [0], [1], [0, 0, 1, 1], [], []>} : vector<48x640xbf16>, vector<640x128xbf16>, vector<48x128xf32> -> vector<48x128xf32>
    %c0_3 = arith.constant 0 : index
    %c0_4 = arith.constant 0 : index
    %3 = vector.load %arg3[%c0_3, %c0_4] : memref<1x128xf32, #tpu.memory_space<vmem>>, vector<1x128xf32>
    %4 = vector.broadcast %3 : vector<1x128xf32> to vector<48x128xf32>
    %5 = arith.addf %2, %4 : vector<48x128xf32>
    %cst_5 = arith.constant 0.000000e+00 : f32
    %6 = vector.broadcast %cst_5 : f32 to vector<48x128xf32>
    %7 = arith.maximumf %5, %6 : vector<48x128xf32>
    %c0_6 = arith.constant 0 : index
    %c0_7 = arith.constant 0 : index
    %8 = vector.load %arg4[%c0_6, %c0_7] : memref<48x128xf32, #tpu.memory_space<vmem>>, vector<48x128xf32>
    tpu.vector_store %arg4[%c0_6, %c0_7], %7 {strides = array<i32>} : memref<48x128xf32, #tpu.memory_space<vmem>>, vector<48x128xf32>,
    return
  }
  func.func @transform_0(%arg0: i32) -> (i32, i32) {
    %c0_i32 = arith.constant 0 : i32
    %c0_i32_0 = arith.constant 0 : i32
    return %arg0, %c0_i32 : i32, i32
  }
  func.func @transform_1(%arg0: i32) -> (i32, i32) {
    %c0_i32 = arith.constant 0 : i32
    %c0_i32_0 = arith.constant 0 : i32
    %c0_i32_1 = arith.constant 0 : i32
    return %c0_i32, %c0_i32_0 : i32, i32
  }
  func.func @transform_2(%arg0: i32) -> (i32, i32) {
    %c0_i32 = arith.constant 0 : i32
    %c0_i32_0 = arith.constant 0 : i32
    %c0_i32_1 = arith.constant 0 : i32
    return %c0_i32, %c0_i32_0 : i32, i32
  }
  func.func @transform_3(%arg0: i32) -> (i32, i32) {
    %c0_i32 = arith.constant 0 : i32
    %c0_i32_0 = arith.constant 0 : i32
    return %arg0, %c0_i32 : i32, i32
  }
}

module attributes {stable_mosaic.version = 11 : i64} {
  func.func @_matmul_bias_act_kernel(%arg0: i32, %arg1: memref<48x1152xbf16, #tpu.memory_space<vmem>>, %arg2: memref<1152x128xbf16, #tpu.memory_space<vmem>>, %arg3: memref<1x128xf32, #tpu.memory_space<vmem>>, %arg4: memref<48x128xf32, #tpu.memory_space<vmem>>) attributes {dimension_semantics = [#tpu.dimension_semantics<parallel>], iteration_bounds = array<i64: 1>, scalar_prefetch = 0 : i64, scratch_operands = 0 : i64, tpu.core_type = #tpu.core_type<tc>, window_params = [{transform_indices = @transform_0, window_bounds = array<i64: 48, 1152>}, {pipeline_mode = #tpu.pipeline_mode<synchronous>, transform_indices = @transform_1, window_bounds = array<i64: 1152, 128>}, {pipeline_mode = #tpu.pipeline_mode<synchronous>, transform_indices = @transform_2, window_bounds = array<i64: 1, 128>}, {transform_indices = @transform_3, window_bounds = array<i64: 48, 128>}]} {
    %c0 = arith.constant 0 : index
    %c0_0 = arith.constant 0 : index
    %0 = vector.load %arg1[%c0, %c0_0] : memref<48x1152xbf16, #tpu.memory_space<vmem>>, vector<48x1152xbf16>
    %c0_1 = arith.constant 0 : index
    %c0_2 = arith.constant 0 : index
    %1 = vector.load %arg2[%c0_1, %c0_2] : memref<1152x128xbf16, #tpu.memory_space<vmem>>, vector<1152x128xbf16>
    %cst = arith.constant dense<0.000000e+00> : vector<48x128xf32>
    %2 = tpu.matmul %0, %1, %cst {dimension_numbers = #tpu.dot_dimension_numbers<[1], [0], [0], [1], [0, 0, 1, 1], [], []>} : vector<48x1152xbf16>, vector<1152x128xbf16>, vector<48x128xf32> -> vector<48x128xf32>
    %c0_3 = arith.constant 0 : index
    %c0_4 = arith.constant 0 : index
    %3 = vector.load %arg3[%c0_3, %c0_4] : memref<1x128xf32, #tpu.memory_space<vmem>>, vector<1x128xf32>
    %4 = vector.broadcast %3 : vector<1x128xf32> to vector<48x128xf32>
    %5 = arith.addf %2, %4 : vector<48x128xf32>
    %cst_5 = arith.constant 0.000000e+00 : f32
    %6 = vector.broadcast %cst_5 : f32 to vector<48x128xf32>
    %7 = arith.maximumf %5, %6 : vector<48x128xf32>
    %c0_6 = arith.constant 0 : index
    %c0_7 = arith.constant 0 : index
    %8 = vector.load %arg4[%c0_6, %c0_7] : memref<48x128xf32, #tpu.memory_space<vmem>>, vector<48x128xf32>
    tpu.vector_store %arg4[%c0_6, %c0_7], %7 {strides = array<i32>} : memref<48x128xf32, #tpu.memory_space<vmem>>, vector<48x128xf32>,
    return
  }
  func.func @transform_0(%arg0: i32) -> (i32, i32) {
    %c0_i32 = arith.constant 0 : i32
    %c0_i32_0 = arith.constant 0 : i32
    return %arg0, %c0_i32 : i32, i32
  }
  func.func @transform_1(%arg0: i32) -> (i32, i32) {
    %c0_i32 = arith.constant 0 : i32
    %c0_i32_0 = arith.constant 0 : i32
    %c0_i32_1 = arith.constant 0 : i32
    return %c0_i32, %c0_i32_0 : i32, i32
  }
  func.func @transform_2(%arg0: i32) -> (i32, i32) {
    %c0_i32 = arith.constant 0 : i32
    %c0_i32_0 = arith.constant 0 : i32
    %c0_i32_1 = arith.constant 0 : i32
    return %c0_i32, %c0_i32_0 : i32, i32
  }
  func.func @transform_3(%arg0: i32) -> (i32, i32) {
    %c0_i32 = arith.constant 0 : i32
    %c0_i32_0 = arith.constant 0 : i32
    return %arg0, %c0_i32 : i32, i32
  }
}

module attributes {stable_mosaic.version = 11 : i64} {
  func.func @_matmul_bias_act_kernel(%arg0: i32, %arg1: memref<8x128xbf16, #tpu.memory_space<vmem>>, %arg2: memref<128x512xbf16, #tpu.memory_space<vmem>>, %arg3: memref<1x512xf32, #tpu.memory_space<vmem>>, %arg4: memref<8x512xf32, #tpu.memory_space<vmem>>) attributes {dimension_semantics = [#tpu.dimension_semantics<parallel>], iteration_bounds = array<i64: 1>, scalar_prefetch = 0 : i64, scratch_operands = 0 : i64, tpu.core_type = #tpu.core_type<tc>, window_params = [{transform_indices = @transform_0, window_bounds = array<i64: 8, 128>}, {pipeline_mode = #tpu.pipeline_mode<synchronous>, transform_indices = @transform_1, window_bounds = array<i64: 128, 512>}, {pipeline_mode = #tpu.pipeline_mode<synchronous>, transform_indices = @transform_2, window_bounds = array<i64: 1, 512>}, {transform_indices = @transform_3, window_bounds = array<i64: 8, 512>}]} {
    %c0 = arith.constant 0 : index
    %c0_0 = arith.constant 0 : index
    %0 = vector.load %arg1[%c0, %c0_0] : memref<8x128xbf16, #tpu.memory_space<vmem>>, vector<8x128xbf16>
    %c0_1 = arith.constant 0 : index
    %c0_2 = arith.constant 0 : index
    %1 = vector.load %arg2[%c0_1, %c0_2] : memref<128x512xbf16, #tpu.memory_space<vmem>>, vector<128x512xbf16>
    %cst = arith.constant dense<0.000000e+00> : vector<8x512xf32>
    %2 = tpu.matmul %0, %1, %cst {dimension_numbers = #tpu.dot_dimension_numbers<[1], [0], [0], [1], [0, 0, 1, 1], [], []>} : vector<8x128xbf16>, vector<128x512xbf16>, vector<8x512xf32> -> vector<8x512xf32>
    %c0_3 = arith.constant 0 : index
    %c0_4 = arith.constant 0 : index
    %3 = vector.load %arg3[%c0_3, %c0_4] : memref<1x512xf32, #tpu.memory_space<vmem>>, vector<1x512xf32>
    %4 = vector.broadcast %3 : vector<1x512xf32> to vector<8x512xf32>
    %5 = arith.addf %2, %4 : vector<8x512xf32>
    %c0_5 = arith.constant 0 : index
    %c0_6 = arith.constant 0 : index
    %6 = vector.load %arg4[%c0_5, %c0_6] : memref<8x512xf32, #tpu.memory_space<vmem>>, vector<8x512xf32>
    tpu.vector_store %arg4[%c0_5, %c0_6], %5 {strides = array<i32>} : memref<8x512xf32, #tpu.memory_space<vmem>>, vector<8x512xf32>,
    return
  }
  func.func @transform_0(%arg0: i32) -> (i32, i32) {
    %c0_i32 = arith.constant 0 : i32
    %c0_i32_0 = arith.constant 0 : i32
    return %arg0, %c0_i32 : i32, i32
  }
  func.func @transform_1(%arg0: i32) -> (i32, i32) {
    %c0_i32 = arith.constant 0 : i32
    %c0_i32_0 = arith.constant 0 : i32
    %c0_i32_1 = arith.constant 0 : i32
    return %c0_i32, %c0_i32_0 : i32, i32
  }
  func.func @transform_2(%arg0: i32) -> (i32, i32) {
    %c0_i32 = arith.constant 0 : i32
    %c0_i32_0 = arith.constant 0 : i32
    %c0_i32_1 = arith.constant 0 : i32
    return %c0_i32, %c0_i32_0 : i32, i32
  }
  func.func @transform_3(%arg0: i32) -> (i32, i32) {
    %c0_i32 = arith.constant 0 : i32
    %c0_i32_0 = arith.constant 0 : i32
    return %arg0, %c0_i32 : i32, i32
  }
}

module attributes {stable_mosaic.version = 11 : i64} {
  func.func @_lstm_kernel(%arg0: i32, %arg1: memref<1x2x512xf32, #tpu.memory_space<vmem>>, %arg2: memref<128x512xbf16, #tpu.memory_space<vmem>>, %arg3: memref<2x128xf32, #tpu.memory_space<vmem>>, %arg4: memref<2x128xf32, #tpu.memory_space<vmem>>, %arg5: memref<2x128xf32, #tpu.memory_space<vmem>>) attributes {dimension_semantics = [#tpu.dimension_semantics<arbitrary>], iteration_bounds = array<i64: 2>, scalar_prefetch = 0 : i64, scratch_operands = 2 : i64, tpu.core_type = #tpu.core_type<tc>, window_params = [{transform_indices = @transform_0, window_bounds = array<i64: 1, 2, 512>}, {pipeline_mode = #tpu.pipeline_mode<synchronous>, transform_indices = @transform_1, window_bounds = array<i64: 128, 512>}, {pipeline_mode = #tpu.pipeline_mode<synchronous>, transform_indices = @transform_2, window_bounds = array<i64: 2, 128>}]} {
    %c0_i32 = arith.constant 0 : i32
    %0 = arith.cmpi eq, %arg0, %c0_i32 : i32
    %1 = arith.extui %0 : i1 to i32
    %c0_i32_0 = arith.constant 0 : i32
    %2 = arith.cmpi ne, %1, %c0_i32_0 : i32
    scf.if %2 {
      %cst_17 = arith.constant 0.000000e+00 : f32
      %41 = vector.broadcast %cst_17 : f32 to vector<2x128xf32>
      %c0_18 = arith.constant 0 : index
      %c0_19 = arith.constant 0 : index
      %42 = vector.load %arg4[%c0_18, %c0_19] : memref<2x128xf32, #tpu.memory_space<vmem>>, vector<2x128xf32>
      tpu.vector_store %arg4[%c0_18, %c0_19], %41 {strides = array<i32>} : memref<2x128xf32, #tpu.memory_space<vmem>>, vector<2x128xf32>,
      %cst_20 = arith.constant 0.000000e+00 : f32
      %43 = vector.broadcast %cst_20 : f32 to vector<2x128xf32>
      %c0_21 = arith.constant 0 : index
      %c0_22 = arith.constant 0 : index
      %44 = vector.load %arg5[%c0_21, %c0_22] : memref<2x128xf32, #tpu.memory_space<vmem>>, vector<2x128xf32>
      tpu.vector_store %arg5[%c0_21, %c0_22], %43 {strides = array<i32>} : memref<2x128xf32, #tpu.memory_space<vmem>>, vector<2x128xf32>,
    } else {
    }
    %c0 = arith.constant 0 : index
    %c0_1 = arith.constant 0 : index
    %c0_2 = arith.constant 0 : index
    %3 = vector.load %arg1[%c0, %c0_1, %c0_2] : memref<1x2x512xf32, #tpu.memory_space<vmem>>, vector<1x2x512xf32>
    %4 = vector.shape_cast %3 : vector<1x2x512xf32> to vector<2x512xf32>
    %c0_3 = arith.constant 0 : index
    %c0_4 = arith.constant 0 : index
    %5 = vector.load %arg4[%c0_3, %c0_4] : memref<2x128xf32, #tpu.memory_space<vmem>>, vector<2x128xf32>
    %6 = arith.truncf %5 : vector<2x128xf32> to vector<2x128xbf16>
    %c0_5 = arith.constant 0 : index
    %c0_6 = arith.constant 0 : index
    %7 = vector.load %arg2[%c0_5, %c0_6] : memref<128x512xbf16, #tpu.memory_space<vmem>>, vector<128x512xbf16>
    %cst = arith.constant dense<0.000000e+00> : vector<2x512xf32>
    %8 = tpu.matmul %6, %7, %cst {dimension_numbers = #tpu.dot_dimension_numbers<[1], [0], [0], [1], [0, 0, 1, 1], [], []>} : vector<2x128xbf16>, vector<128x512xbf16>, vector<2x512xf32> -> vector<2x512xf32>
    %9 = arith.addf %4, %8 : vector<2x512xf32>
    %10 = vector.extract_strided_slice %9 {offsets = [0, 0], sizes = [2, 128], strides = [1, 1]} : vector<2x512xf32> to vector<2x128xf32>
    %11 = arith.negf %10 : vector<2x128xf32>
    %12 = math.exp %11 : vector<2x128xf32>
    %cst_7 = arith.constant 1.000000e+00 : f32
    %13 = vector.broadcast %cst_7 : f32 to vector<2x128xf32>
    %14 = arith.addf %13, %12 : vector<2x128xf32>
    %15 = arith.divf %13, %14 : vector<2x128xf32>
    %16 = vector.extract_strided_slice %9 {offsets = [0, 128], sizes = [2, 128], strides = [1, 1]} : vector<2x512xf32> to vector<2x128xf32>
    %17 = arith.negf %16 : vector<2x128xf32>
    %18 = math.exp %17 : vector<2x128xf32>
    %cst_8 = arith.constant 1.000000e+00 : f32
    %19 = vector.broadcast %cst_8 : f32 to vector<2x128xf32>
    %20 = arith.addf %19, %18 : vector<2x128xf32>
    %21 = arith.divf %19, %20 : vector<2x128xf32>
    %22 = vector.extract_strided_slice %9 {offsets = [0, 256], sizes = [2, 128], strides = [1, 1]} : vector<2x512xf32> to vector<2x128xf32>
    %23 = math.tanh %22 : vector<2x128xf32>
    %24 = vector.extract_strided_slice %9 {offsets = [0, 384], sizes = [2, 128], strides = [1, 1]} : vector<2x512xf32> to vector<2x128xf32>
    %25 = arith.negf %24 : vector<2x128xf32>
    %26 = math.exp %25 : vector<2x128xf32>
    %cst_9 = arith.constant 1.000000e+00 : f32
    %27 = vector.broadcast %cst_9 : f32 to vector<2x128xf32>
    %28 = arith.addf %27, %26 : vector<2x128xf32>
    %29 = arith.divf %27, %28 : vector<2x128xf32>
    %c0_10 = arith.constant 0 : index
    %c0_11 = arith.constant 0 : index
    %30 = vector.load %arg5[%c0_10, %c0_11] : memref<2x128xf32, #tpu.memory_space<vmem>>, vector<2x128xf32>
    %31 = arith.mulf %21, %30 : vector<2x128xf32>
    %32 = arith.mulf %15, %23 : vector<2x128xf32>
    %33 = arith.addf %31, %32 : vector<2x128xf32>
    %34 = math.tanh %33 : vector<2x128xf32>
    %35 = arith.mulf %29, %34 : vector<2x128xf32>
    %c0_12 = arith.constant 0 : index
    %c0_13 = arith.constant 0 : index
    %36 = vector.load %arg5[%c0_12, %c0_13] : memref<2x128xf32, #tpu.memory_space<vmem>>, vector<2x128xf32>
    tpu.vector_store %arg5[%c0_12, %c0_13], %33 {strides = array<i32>} : memref<2x128xf32, #tpu.memory_space<vmem>>, vector<2x128xf32>,
    %c0_14 = arith.constant 0 : index
    %c0_15 = arith.constant 0 : index
    %37 = vector.load %arg4[%c0_14, %c0_15] : memref<2x128xf32, #tpu.memory_space<vmem>>, vector<2x128xf32>
    tpu.vector_store %arg4[%c0_14, %c0_15], %35 {strides = array<i32>} : memref<2x128xf32, #tpu.memory_space<vmem>>, vector<2x128xf32>,
    %c1_i32 = arith.constant 1 : i32
    %38 = arith.cmpi eq, %arg0, %c1_i32 : i32
    %39 = arith.extui %38 : i1 to i32
    %c0_i32_16 = arith.constant 0 : i32
    %40 = arith.cmpi ne, %39, %c0_i32_16 : i32
    scf.if %40 {
      %c0_17 = arith.constant 0 : index
      %c0_18 = arith.constant 0 : index
      %41 = vector.load %arg3[%c0_17, %c0_18] : memref<2x128xf32, #tpu.memory_space<vmem>>, vector<2x128xf32>
      tpu.vector_store %arg3[%c0_17, %c0_18], %35 {strides = array<i32>} : memref<2x128xf32, #tpu.memory_space<vmem>>, vector<2x128xf32>,
    } else {
    }
    return
  }
  func.func @transform_0(%arg0: i32) -> (i32, i32, i32) {
    %c0_i32 = arith.constant 0 : i32
    %c0_i32_0 = arith.constant 0 : i32
    %c0_i32_1 = arith.constant 0 : i32
    return %arg0, %c0_i32, %c0_i32_0 : i32, i32, i32
  }
  func.func @transform_1(%arg0: i32) -> (i32, i32) {
    %c0_i32 = arith.constant 0 : i32
    %c0_i32_0 = arith.constant 0 : i32
    %c0_i32_1 = arith.constant 0 : i32
    return %c0_i32, %c0_i32_0 : i32, i32
  }
  func.func @transform_2(%arg0: i32) -> (i32, i32) {
    %c0_i32 = arith.constant 0 : i32
    %c0_i32_0 = arith.constant 0 : i32
    %c0_i32_1 = arith.constant 0 : i32
    return %c0_i32, %c0_i32_0 : i32, i32
  }
}

module attributes {stable_mosaic.version = 11 : i64} {
  func.func @_matmul_bias_act_kernel(%arg0: i32, %arg1: memref<8x128xbf16, #tpu.memory_space<vmem>>, %arg2: memref<128x128xbf16, #tpu.memory_space<vmem>>, %arg3: memref<1x128xf32, #tpu.memory_space<vmem>>, %arg4: memref<8x128xf32, #tpu.memory_space<vmem>>) attributes {dimension_semantics = [#tpu.dimension_semantics<parallel>], iteration_bounds = array<i64: 1>, scalar_prefetch = 0 : i64, scratch_operands = 0 : i64, tpu.core_type = #tpu.core_type<tc>, window_params = [{transform_indices = @transform_0, window_bounds = array<i64: 8, 128>}, {pipeline_mode = #tpu.pipeline_mode<synchronous>, transform_indices = @transform_1, window_bounds = array<i64: 128, 128>}, {pipeline_mode = #tpu.pipeline_mode<synchronous>, transform_indices = @transform_2, window_bounds = array<i64: 1, 128>}, {transform_indices = @transform_3, window_bounds = array<i64: 8, 128>}]} {
    %c0 = arith.constant 0 : index
    %c0_0 = arith.constant 0 : index
    %0 = vector.load %arg1[%c0, %c0_0] : memref<8x128xbf16, #tpu.memory_space<vmem>>, vector<8x128xbf16>
    %c0_1 = arith.constant 0 : index
    %c0_2 = arith.constant 0 : index
    %1 = vector.load %arg2[%c0_1, %c0_2] : memref<128x128xbf16, #tpu.memory_space<vmem>>, vector<128x128xbf16>
    %cst = arith.constant dense<0.000000e+00> : vector<8x128xf32>
    %2 = tpu.matmul %0, %1, %cst {dimension_numbers = #tpu.dot_dimension_numbers<[1], [0], [0], [1], [0, 0, 1, 1], [], []>} : vector<8x128xbf16>, vector<128x128xbf16>, vector<8x128xf32> -> vector<8x128xf32>
    %c0_3 = arith.constant 0 : index
    %c0_4 = arith.constant 0 : index
    %3 = vector.load %arg3[%c0_3, %c0_4] : memref<1x128xf32, #tpu.memory_space<vmem>>, vector<1x128xf32>
    %4 = vector.broadcast %3 : vector<1x128xf32> to vector<8x128xf32>
    %5 = arith.addf %2, %4 : vector<8x128xf32>
    %c0_5 = arith.constant 0 : index
    %c0_6 = arith.constant 0 : index
    %6 = vector.load %arg4[%c0_5, %c0_6] : memref<8x128xf32, #tpu.memory_space<vmem>>, vector<8x128xf32>
    tpu.vector_store %arg4[%c0_5, %c0_6], %5 {strides = array<i32>} : memref<8x128xf32, #tpu.memory_space<vmem>>, vector<8x128xf32>,
    return
  }
  func.func @transform_0(%arg0: i32) -> (i32, i32) {
    %c0_i32 = arith.constant 0 : i32
    %c0_i32_0 = arith.constant 0 : i32
    return %arg0, %c0_i32 : i32, i32
  }
  func.func @transform_1(%arg0: i32) -> (i32, i32) {
    %c0_i32 = arith.constant 0 : i32
    %c0_i32_0 = arith.constant 0 : i32
    %c0_i32_1 = arith.constant 0 : i32
    return %c0_i32, %c0_i32_0 : i32, i32
  }
  func.func @transform_2(%arg0: i32) -> (i32, i32) {
    %c0_i32 = arith.constant 0 : i32
    %c0_i32_0 = arith.constant 0 : i32
    %c0_i32_1 = arith.constant 0 : i32
    return %c0_i32, %c0_i32_0 : i32, i32
  }
  func.func @transform_3(%arg0: i32) -> (i32, i32) {
    %c0_i32 = arith.constant 0 : i32
    %c0_i32_0 = arith.constant 0 : i32
    return %arg0, %c0_i32 : i32, i32
  }
}

</mosaic_0001>

<bundles_post_ra>
// kernel: forward.8
= control target key start
LH: loop header
LB: loop body
LE: loop exit
PB: predicated region body
PF: predicated region fallthrough
CT: control target
= control target key end

     0   :  { %s831_s12 = smov 0   ;;  %s963_s0 = inlined_call_operand.vmem [shape: bf16[1736,128], index: 0, kind: input, shape index: {}]   ;;  %s964_s1 = inlined_call_operand.vmem [shape: bf16[128,128], index: 1, kind: input, shape index: {}]   ;;  %s965_s2 = inlined_call_operand.vmem [shape: f32[1,128], index: 2, kind: input, shape index: {}]   ;;  %s966_s3 = inlined_call_operand.vmem [shape: f32[1736,128], index: 3, kind: output, shape index: {}]  }
   0x1 LB: > { %s649_s13 = sadd.s32 4294967295, %s809_s12   ;;  %p653_p0 = scmp.ge.s32.totalorder %s809_s12, 1  ;;  %s809_s12 = sphi %s831_s12, %s13_s12  }
   0x2   : > { %p138_p1 = scmp.lt.s32.totalorder %s809_s12, 8 }
   0x4   : > { %p139_p2 = pnand %p653_p0, %p138_p1 }
   0x5   : > { %v779_v0 = vld [vmem:[%s964_s1] sm:$0xff] (!%p139_p2)   ;;  %s162_s16 = smul.u32 (!%p139_p2), 31, %s649_s13  ;;  %v780_v1 = vld [vmem:[%s964_s1 + $0x8] sm:$0xff] (!%p139_p2)   ;;  %v781_v2 = vld [vmem:[%s964_s1 + $0x10] sm:$0xff] (!%p139_p2)  }
   0x6   : > { %142 = sbr.rel (%p139_p2) target bundleno = 282 (0x11a), region = 32  ;;  %707 = vmatprep.subr.bf16.mxu0 (!%p139_p2), %v779_v0  ;;  %755 = vmatprep.subr.bf16.mxu1 (!%p139_p2), %v779_v0  ;;  %v782_v3 = vld [vmem:[%s964_s1 + $0x18] sm:$0xff] (!%p139_p2)   ;;  %v783_v6 = vld [vmem:[%s964_s1 + $0x20] sm:$0xff] (!%p139_p2)   ;;  %v784_v7 = vld [vmem:[%s964_s1 + $0x28] sm:$0xff] (!%p139_p2)  }
   0x7   : > { %p163_p3 = scmp.lt.s32.totalorder (!%p139_p2), %s162_s16, 216  ;;  %708 = vmatpush3.bf16.msra.mxu0 (!%p139_p2), %v779_v0  ;;  %763 = vmatpush3.bf16.msra.mxu1 (!%p139_p2), %v779_v0  ;;  %v785_v8 = vld [vmem:[%s964_s1 + $0x30] sm:$0xff] (!%p139_p2)   ;;  %v786_v9 = vld [vmem:[%s964_s1 + $0x38] sm:$0xff] (!%p139_p2)   ;;  %v890_v24 = vld [vmem:[%s965_s2] ss:$0 sm:$0xff] (!%p139_p2) }
   0x8   : > { %709 = vmatprep.subr.bf16.mxu0 (!%p139_p2), %v780_v1  ;;  %756 = vmatprep.subr.bf16.mxu1 (!%p139_p2), %v780_v1 }
   0xb   : > { %710 = vmatpush3.bf16.msra.mxu0 (!%p139_p2), %v780_v1  ;;  %764 = vmatpush3.bf16.msra.mxu1 (!%p139_p2), %v780_v1 }
   0xc   : > { %711 = vmatprep.subr.bf16.mxu0 (!%p139_p2), %v781_v2  ;;  %757 = vmatprep.subr.bf16.mxu1 (!%p139_p2), %v781_v2 }
   0xd   : > { %s968_s16 = smov (!%p163_p3, %s162_s16), 216 }
   0xe   : > { %s654_s21 = sshll.u32 %s968_s16, 2  ;;  %s655_s10 = sshll.u32 %s968_s16, 3 }
   0xf   : > { %s857_s26 = scalar_lea.vmem %s963_s0, %s654_s21  ;;  %712 = vmatpush3.bf16.msra.mxu0 %v781_v2  ;;  %765 = vmatpush3.bf16.msra.mxu1 %v781_v2  ;;  %s898_s14 = scalar_lea.vmem %s966_s3, %s655_s10 }
  0x10   : > { %v787_v4 = vld [vmem:[%s857_s26] sm:$0xff]   ;;  %713 = vmatprep.subr.bf16.mxu0 %v782_v3  ;;  %758 = vmatprep.subr.bf16.mxu1 %v782_v3  ;;  %v789_v10 = vld [vmem:[%s857_s26 + $0x8] sm:$0xff]   ;;  %v791_v12 = vld [vmem:[%s857_s26 + $0x10] sm:$0xff]  }
  0x11   : > { %v788_v5 = vld [vmem:[%s857_s26 + $0x40] sm:$0xff]   ;;  %723 = vmatprep.mubr.bf16.mxu0 %v787_v4  ;;  %v790_v11 = vld [vmem:[%s857_s26 + $0x48] sm:$0xff]   ;;  %v792_v13 = vld [vmem:[%s857_s26 + $0x50] sm:$0xff]  }
  0x12   : > { %739 = vmatprep.mubr.bf16.mxu1 %v788_v5  ;;  %v793_v14 = vld [vmem:[%s857_s26 + $0x18] sm:$0xff]   ;;  %v795_v16 = vld [vmem:[%s857_s26 + $0x20] sm:$0xff]   ;;  %v797_v18 = vld [vmem:[%s857_s26 + $0x28] sm:$0xff]  }
  0x13   : > { %714 = vmatpush3.bf16.msra.mxu0 %v782_v3  ;;  %766 = vmatpush3.bf16.msra.mxu1 %v782_v3  ;;  %v794_v15 = vld [vmem:[%s857_s26 + $0x58] sm:$0xff]   ;;  %v796_v17 = vld [vmem:[%s857_s26 + $0x60] sm:$0xff]   ;;  %v798_v19 = vld [vmem:[%s857_s26 + $0x68] sm:$0xff]  }
  0x14   : > { %715 = vmatprep.subr.bf16.mxu0 %v783_v6  ;;  %759 = vmatprep.subr.bf16.mxu1 %v783_v6  ;;  %v799_v20 = vld [vmem:[%s857_s26 + $0x30] sm:$0xff]   ;;  %v801_v22 = vld [vmem:[%s857_s26 + $0x38] sm:$0xff]  }
  0x15   : > { %v800_v21 = vld [vmem:[%s857_s26 + $0x70] sm:$0xff]   ;;  %v802_v23 = vld [vmem:[%s857_s26 + $0x78] ss:$0 sps:$4 sm:$0xff]  }
  0x17   : > { %716 = vmatpush3.bf16.msra.mxu0 %v783_v6  ;;  %767 = vmatpush3.bf16.msra.mxu1 %v783_v6 }
  0x18   : > { %717 = vmatprep.subr.bf16.mxu0 %v784_v7  ;;  %760 = vmatprep.subr.bf16.mxu1 %v784_v7 }
  0x1b   : > { %718 = vmatpush3.bf16.msra.mxu0 %v784_v7  ;;  %768 = vmatpush3.bf16.msra.mxu1 %v784_v7 }
  0x1c   : > { %719 = vmatprep.subr.bf16.mxu0 %v785_v8  ;;  %761 = vmatprep.subr.bf16.mxu1 %v785_v8 }
  0x1f   : > { %720 = vmatpush3.bf16.msra.mxu0 %v785_v8  ;;  %769 = vmatpush3.bf16.msra.mxu1 %v785_v8 }
  0x20   : > { %721 = vmatprep.subr.bf16.mxu0 %v786_v9  ;;  %762 = vmatprep.subr.bf16.mxu1 %v786_v9 }
  0x23   : > { %722 = vmatpush3.bf16.msra.mxu0 %v786_v9  ;;  %770 = vmatpush3.bf16.msra.mxu1 %v786_v9 }
  0x26   : > { %724 = vmatmul.mubr.bf16.vlgmr.msra.gmra.mrb[0].mxu0 %v789_v10  ;;  %740 = vmatmul.mubr.bf16.vlgmr.msra.gmra.mrb[0].mxu1 %v790_v11 }
  0x27   : > { %727 = vmatprep.mubr.bf16.mxu0 %v791_v12  ;;  %743 = vmatprep.mubr.bf16.mxu1 %v792_v13 }
  0x2e   : > { %728 = vmatmul.mubr.bf16.gmra.mrb[4].mxu0 %v793_v14  ;;  %744 = vmatmul.mubr.bf16.gmra.mrb[4].mxu1 %v794_v15 }
  0x2f   : > { %731 = vmatprep.mubr.bf16.mxu0 %v795_v16  ;;  %747 = vmatprep.mubr.bf16.mxu1 %v796_v17 }
  0x36   : > { %732 = vmatmul.mubr.bf16.gmra.mrb[8].mxu0 %v797_v18  ;;  %748 = vmatmul.mubr.bf16.gmra.mrb[8].mxu1 %v798_v19 }
  0x37   : > { %735 = vmatprep.mubr.bf16.mxu0 %v799_v20  ;;  %751 = vmatprep.mubr.bf16.mxu1 %v800_v21 }
  0x3e   : > { %736 = vmatmul.mubr.bf16.gmra.mrb[12].mxu0 %v801_v22  ;;  %752 = vmatmul.mubr.bf16.gmra.mrb[12].mxu1 %v802_v23 }
  0xf9   : > { %v725_v25 = vpop.f32.mrb[0].mxu0  ;;  %v741_v26 = vpop.f32.mrb[0].mxu1 }
  0xfa   : > { %v414_v27 = vadd.f32 %v725_v25, %v890_v24  ;;  %v478_v28 = vadd.f32 %v741_v26, %v890_v24  ;;  %v405_v29 = vpop.f32.mrb[1].mxu0  ;;  %v469_v30 = vpop.f32.mrb[1].mxu1 }
  0xfb   : > { %v406_v31 = vadd.f32 %v890_v24, %v405_v29  ;;  %v470_v32 = vadd.f32 %v890_v24, %v469_v30  ;;  %v726_v33 = vpop.f32.mrb[2].mxu0  ;;  %v742_v34 = vpop.f32.mrb[2].mxu1 }
  0xfc   : > { %v533_v35 = vmax.f32 %v414_v27, 0.0  ;;  %v549_v36 = vmax.f32 %v478_v28, 0.0  ;;  %v417_v37 = vadd.f32 %v726_v33, %v890_v24  ;;  %v481_v38 = vadd.f32 %v742_v34, %v890_v24  ;;  %v408_v39 = vpop.f32.mrb[3].mxu0  ;;  %v472_v40 = vpop.f32.mrb[3].mxu1 }
  0xfd   : > { %v531_v41 = vmax.f32 %v406_v31, 0.0  ;;  %v547_v42 = vmax.f32 %v470_v32, 0.0  ;;  %v409_v43 = vadd.f32 %v890_v24, %v408_v39  ;;  %v473_v44 = vadd.f32 %v890_v24, %v472_v40 }
  0xfe   : > { %564 = vst [vmem:[%s898_s14 + $0x10] sm:$0xff] %v533_v35  ;;  %580 = vst [vmem:[%s898_s14 + $0x90] sm:$0xff] %v549_v36  ;;  %v534_v45 = vmax.f32 %v417_v37, 0.0  ;;  %v550_v46 = vmax.f32 %v481_v38, 0.0 }
  0xff   : > { %562 = vst [vmem:[%s898_s14] sm:$0xff] %v531_v41  ;;  %578 = vst [vmem:[%s898_s14 + $0x80] sm:$0xff] %v547_v42  ;;  %v532_v47 = vmax.f32 %v409_v43, 0.0  ;;  %v548_v48 = vmax.f32 %v473_v44, 0.0 }
 0x100   : > { %565 = vst [vmem:[%s898_s14 + $0x18] sm:$0xff] %v534_v45  ;;  %581 = vst [vmem:[%s898_s14 + $0x98] sm:$0xff] %v550_v46 }
 0x101   : > { %563 = vst [vmem:[%s898_s14 + $0x8] sm:$0xff] %v532_v47  ;;  %579 = vst [vmem:[%s898_s14 + $0x88] sm:$0xff] %v548_v48  ;;  %v729_v49 = vpop.f32.mrb[4].mxu0  ;;  %v745_v50 = vpop.f32.mrb[4].mxu1 }
 0x102   : > { %v430_v51 = vadd.f32 %v729_v49, %v890_v24  ;;  %v494_v52 = vadd.f32 %v745_v50, %v890_v24  ;;  %v421_v53 = vpop.f32.mrb[5].mxu0  ;;  %v485_v54 = vpop.f32.mrb[5].mxu1 }
 0x103   : > { %v422_v55 = vadd.f32 %v890_v24, %v421_v53  ;;  %v486_v56 = vadd.f32 %v890_v24, %v485_v54  ;;  %v730_v57 = vpop.f32.mrb[6].mxu0  ;;  %v746_v58 = vpop.f32.mrb[6].mxu1 }
 0x104   : > { %v537_v59 = vmax.f32 %v430_v51, 0.0  ;;  %v553_v60 = vmax.f32 %v494_v52, 0.0  ;;  %v433_v61 = vadd.f32 %v730_v57, %v890_v24  ;;  %v497_v62 = vadd.f32 %v746_v58, %v890_v24  ;;  %v424_v63 = vpop.f32.mrb[7].mxu0  ;;  %v488_v0 = vpop.f32.mrb[7].mxu1 }
 0x105   : > { %v535_v1 = vmax.f32 %v422_v55, 0.0  ;;  %v551_v2 = vmax.f32 %v486_v56, 0.0  ;;  %v425_v3 = vadd.f32 %v890_v24, %v424_v63  ;;  %v489_v4 = vadd.f32 %v890_v24, %v488_v0 }
 0x106   : > { %568 = vst [vmem:[%s898_s14 + $0x30] sm:$0xff] %v537_v59  ;;  %584 = vst [vmem:[%s898_s14 + $0xb0] sm:$0xff] %v553_v60  ;;  %v538_v5 = vmax.f32 %v433_v61, 0.0  ;;  %v554_v6 = vmax.f32 %v497_v62, 0.0 }
 0x107   : > { %566 = vst [vmem:[%s898_s14 + $0x20] sm:$0xff] %v535_v1  ;;  %582 = vst [vmem:[%s898_s14 + $0xa0] sm:$0xff] %v551_v2  ;;  %v536_v7 = vmax.f32 %v425_v3, 0.0  ;;  %v552_v8 = vmax.f32 %v489_v4, 0.0 }
 0x108   : > { %569 = vst [vmem:[%s898_s14 + $0x38] sm:$0xff] %v538_v5  ;;  %585 = vst [vmem:[%s898_s14 + $0xb8] sm:$0xff] %v554_v6 }
 0x109   : > { %567 = vst [vmem:[%s898_s14 + $0x28] sm:$0xff] %v536_v7  ;;  %583 = vst [vmem:[%s898_s14 + $0xa8] sm:$0xff] %v552_v8  ;;  %v733_v9 = vpop.f32.mrb[8].mxu0  ;;  %v749_v10 = vpop.f32.mrb[8].mxu1 }
 0x10a   : > { %v446_v11 = vadd.f32 %v733_v9, %v890_v24  ;;  %v510_v12 = vadd.f32 %v749_v10, %v890_v24  ;;  %v437_v13 = vpop.f32.mrb[9].mxu0  ;;  %v501_v14 = vpop.f32.mrb[9].mxu1 }
 0x10b   : > { %v438_v15 = vadd.f32 %v890_v24, %v437_v13  ;;  %v502_v16 = vadd.f32 %v890_v24, %v501_v14  ;;  %v734_v17 = vpop.f32.mrb[10].mxu0  ;;  %v750_v18 = vpop.f32.mrb[10].mxu1 }
 0x10c   : > { %v541_v19 = vmax.f32 %v446_v11, 0.0  ;;  %v557_v20 = vmax.f32 %v510_v12, 0.0  ;;  %v449_v21 = vadd.f32 %v734_v17, %v890_v24  ;;  %v513_v22 = vadd.f32 %v750_v18, %v890_v24  ;;  %v440_v23 = vpop.f32.mrb[11].mxu0  ;;  %v504_v25 = vpop.f32.mrb[11].mxu1 }
 0x10d   : > { %v539_v26 = vmax.f32 %v438_v15, 0.0  ;;  %v555_v27 = vmax.f32 %v502_v16, 0.0  ;;  %v441_v28 = vadd.f32 %v890_v24, %v440_v23  ;;  %v505_v29 = vadd.f32 %v890_v24, %v504_v25 }
 0x10e   : > { %572 = vst [vmem:[%s898_s14 + $0x50] sm:$0xff] %v541_v19  ;;  %588 = vst [vmem:[%s898_s14 + $0xd0] sm:$0xff] %v557_v20  ;;  %v542_v30 = vmax.f32 %v449_v21, 0.0  ;;  %v558_v31 = vmax.f32 %v513_v22, 0.0 }
 0x10f   : > { %570 = vst [vmem:[%s898_s14 + $0x40] sm:$0xff] %v539_v26  ;;  %586 = vst [vmem:[%s898_s14 + $0xc0] sm:$0xff] %v555_v27  ;;  %v540_v32 = vmax.f32 %v441_v28, 0.0  ;;  %v556_v33 = vmax.f32 %v505_v29, 0.0 }
 0x110   : > { %573 = vst [vmem:[%s898_s14 + $0x58] sm:$0xff] %v542_v30  ;;  %589 = vst [vmem:[%s898_s14 + $0xd8] sm:$0xff] %v558_v31 }
 0x111   : > { %571 = vst [vmem:[%s898_s14 + $0x48] sm:$0xff] %v540_v32  ;;  %587 = vst [vmem:[%s898_s14 + $0xc8] sm:$0xff] %v556_v33  ;;  %v737_v34 = vpop.f32.mrb[12].mxu0  ;;  %v753_v35 = vpop.f32.mrb[12].mxu1 }
 0x112   : > { %v462_v36 = vadd.f32 %v737_v34, %v890_v24  ;;  %v526_v37 = vadd.f32 %v753_v35, %v890_v24  ;;  %v453_v38 = vpop.f32.mrb[13].mxu0  ;;  %v517_v39 = vpop.f32.mrb[13].mxu1 }
 0x113   : > { %v454_v40 = vadd.f32 %v890_v24, %v453_v38  ;;  %v518_v41 = vadd.f32 %v890_v24, %v517_v39  ;;  %v738_v42 = vpop.f32.mrb[14].mxu0  ;;  %v754_v43 = vpop.f32.mrb[14].mxu1 }
 0x114   : > { %v545_v44 = vmax.f32 %v462_v36, 0.0  ;;  %v561_v45 = vmax.f32 %v526_v37, 0.0  ;;  %v465_v46 = vadd.f32 %v738_v42, %v890_v24  ;;  %v456_v47 = vpop.f32.mrb[15].mxu0  ;;  %v520_v48 = vpop.f32.mrb[15].mxu1 }
 0x115   : > { %v543_v49 = vmax.f32 %v454_v40, 0.0  ;;  %v559_v50 = vmax.f32 %v518_v41, 0.0  ;;  %v457_v51 = vadd.f32 %v890_v24, %v456_v47  ;;  %v521_v52 = vadd.f32 %v890_v24, %v520_v48 }
 0x116   : > { %576 = vst [vmem:[%s898_s14 + $0x70] sm:$0xff] %v545_v44  ;;  %592 = vst [vmem:[%s898_s14 + $0xf0] sm:$0xff] %v561_v45  ;;  %v546_v53 = vmax.f32 %v465_v46, 0.0 }
 0x117   : > { %574 = vst [vmem:[%s898_s14 + $0x60] sm:$0xff] %v543_v49  ;;  %590 = vst [vmem:[%s898_s14 + $0xe0] sm:$0xff] %v559_v50  ;;  %v544_v54 = vmax.f32 %v457_v51, 0.0  ;;  %v560_v55 = vmax.f32 %v521_v52, 0.0 }
 0x118   : > { %577 = vst [vmem:[%s898_s14 + $0x78] sm:$0xff] %v546_v53 }
 0x119   : > { %575 = vst [vmem:[%s898_s14 + $0x68] sm:$0xff] %v544_v54  ;;  %591 = vst [vmem:[%s898_s14 + $0xe8] sm:$0xff] %v560_v55 }
 0x11a PF: > { %s13_s12 = sadd.s32 1, %s809_s12  }
 0x11b   : > { %p10_p4 = scmp.ge.s32.totalorder %s13_s12, 9  }
 0x11d   :  { %12 = sbr.rel (!%p10_p4) target bundleno = 1 (0x1), region = 62 }

// kernel: forward.9
= control target key start
LH: loop header
LB: loop body
LE: loop exit
PB: predicated region body
PF: predicated region fallthrough
CT: control target
= control target key end

     0   :  { %s1664_s12 = smov 0   ;;  %s1969_s0 = inlined_call_operand.vmem [shape: bf16[288,640], index: 0, kind: input, shape index: {}]   ;;  %s1970_s1 = inlined_call_operand.vmem [shape: bf16[640,128], index: 1, kind: input, shape index: {}]   ;;  %s1971_s2 = inlined_call_operand.vmem [shape: f32[1,128], index: 2, kind: input, shape index: {}]   ;;  %s1972_s3 = inlined_call_operand.vmem [shape: f32[288,128], index: 3, kind: output, shape index: {}]  }
   0x1 LB: > { %s1200_s13 = sadd.s32 4294967295, %s1640_s12   ;;  %p1204_p0 = scmp.ge.s32.totalorder %s1640_s12, 1  ;;  %s1640_s12 = sphi %s1664_s12, %s13_s12  }
   0x2   : > { %p139_p1 = scmp.lt.s32.totalorder %s1640_s12, 3 }
   0x4   : > { %p140_p2 = pnand %p1204_p0, %p139_p1 }
   0x5   : > { %v1531_v0 = vld [vmem:[%s1970_s1 + $0x40] sm:$0xff] (!%p140_p2)   ;;  %s164_s16 = smul.u32 (!%p140_p2), 18, %s1200_s13  ;;  %v1533_v2 = vld [vmem:[%s1970_s1 + $0x48] sm:$0xff] (!%p140_p2)   ;;  %v1535_v4 = vld [vmem:[%s1970_s1 + $0x50] sm:$0xff] (!%p140_p2)   ;;  %v1642_v24 = vmov (!%p140_p2), 0.0   ;;  %vm1643_vm0 = vmmov (!%p140_p2), 0  }
   0x6   : > { %143 = sbr.rel (%p140_p2) target bundleno = 366 (0x16e), region = 32  ;;  %v1532_v1 = vld [vmem:[%s1970_s1] sm:$0xff] (!%p140_p2)   ;;  %1504 = vmatprep.subr.bf16.mxu1 (!%p140_p2), %v1531_v0  ;;  %1295 = vmatprep.subr.bf16.mxu0 (!%p140_p2), %v1531_v0  ;;  %v1534_v3 = vld [vmem:[%s1970_s1 + $0x8] sm:$0xff] (!%p140_p2)   ;;  %v1536_v5 = vld [vmem:[%s1970_s1 + $0x10] sm:$0xff] (!%p140_p2)  }
   0x7   : > { %p165_p3 = scmp.lt.s32.totalorder (!%p140_p2), %s164_s16, 35  ;;  %1512 = vmatpush3.bf16.msra.mxu1 (!%p140_p2), %v1532_v1  ;;  %1296 = vmatpush3.bf16.msra.mxu0 (!%p140_p2), %v1532_v1  ;;  %v1537_v6 = vld [vmem:[%s1970_s1 + $0x58] sm:$0xff] (!%p140_p2)   ;;  %v1539_v8 = vld [vmem:[%s1970_s1 + $0x60] sm:$0xff] (!%p140_p2)   ;;  %v1541_v10 = vld [vmem:[%s1970_s1 + $0x68] sm:$0xff] (!%p140_p2)  }
   0x8   : > { %1505 = vmatprep.subr.bf16.mxu1 (!%p140_p2), %v1533_v2  ;;  %1297 = vmatprep.subr.bf16.mxu0 (!%p140_p2), %v1533_v2  ;;  %v1538_v7 = vld [vmem:[%s1970_s1 + $0x18] sm:$0xff] (!%p140_p2)   ;;  %v1540_v9 = vld [vmem:[%s1970_s1 + $0x20] sm:$0xff] (!%p140_p2)   ;;  %v1542_v12 = vld [vmem:[%s1970_s1 + $0x28] sm:$0xff] (!%p140_p2)  }
   0x9   : > { %v1543_v13 = vld [vmem:[%s1970_s1 + $0x70] sm:$0xff] (!%p140_p2)   ;;  %v1545_v16 = vld [vmem:[%s1970_s1 + $0x78] sm:$0xff] (!%p140_p2)   ;;  %v1550_v19 = vld [vmem:[%s1970_s1 + $0xc0] sm:$0xff] (!%p140_p2)  }
   0xa   : > { %v1544_v14 = vld [vmem:[%s1970_s1 + $0x30] sm:$0xff] (!%p140_p2)   ;;  %v1546_v17 = vld [vmem:[%s1970_s1 + $0x38] sm:$0xff] (!%p140_p2)   ;;  %v1551_v20 = vld [vmem:[%s1970_s1 + $0x80] sm:$0xff] (!%p140_p2)  }
   0xb   : > { %1513 = vmatpush3.bf16.msra.mxu1 (!%p140_p2), %v1534_v3  ;;  %1298 = vmatpush3.bf16.msra.mxu0 (!%p140_p2), %v1534_v3  ;;  %v1552_v23 = vld [vmem:[%s1970_s1 + $0xc8] sm:$0xff] (!%p140_p2)   ;;  %v1562_v25 = vld [vmem:[%s1970_s1 + $0x100] sm:$0xff] (!%p140_p2)   ;;  %v1560_v29 = vld [vmem:[%s1970_s1 + $0xd0] sm:$0xff] (!%p140_p2)  }
   0xc   : > { %1506 = vmatprep.subr.bf16.mxu1 (!%p140_p2), %v1535_v4  ;;  %1299 = vmatprep.subr.bf16.mxu0 (!%p140_p2), %v1535_v4  ;;  %v1553_v27 = vld [vmem:[%s1970_s1 + $0x88] sm:$0xff] (!%p140_p2)   ;;  %v1561_v31 = vld [vmem:[%s1970_s1 + $0x90] sm:$0xff] (!%p140_p2)   ;;  %v1565_v34 = vld [vmem:[%s1970_s1 + $0xd8] sm:$0xff] (!%p140_p2)  }
   0xd   : > { %s1974_s16 = smov (!%p165_p3, %s164_s16), 35  ;;  %v1568_v30 = vld [vmem:[%s1970_s1 + $0x108] sm:$0xff]   ;;  %v1573_v35 = vld [vmem:[%s1970_s1 + $0x110] sm:$0xff]   ;;  %v1567_v37 = vld [vmem:[%s1970_s1 + $0x98] sm:$0xff]  }
   0xe   : > { %s1520_s29 = smul.u32 20, %s1974_s16  ;;  %v1572_v38 = vld [vmem:[%s1970_s1 + $0xe0] sm:$0xff]   ;;  %v1578_v39 = vld [vmem:[%s1970_s1 + $0x118] sm:$0xff]   ;;  %v1579_v44 = vld [vmem:[%s1970_s1 + $0xe8] sm:$0xff]   ;;  %s1206_s27 = sshll.u32 %s1974_s16, 3 }
   0xf   : > { %1514 = vmatpush3.bf16.msra.mxu1 %v1536_v5  ;;  %1300 = vmatpush3.bf16.msra.mxu0 %v1536_v5  ;;  %v1574_v41 = vld [vmem:[%s1970_s1 + $0xa0] sm:$0xff]   ;;  %v1582_v47 = vld [vmem:[%s1970_s1 + $0xa8] sm:$0xff]   ;;  %v1585_v48 = vld [vmem:[%s1970_s1 + $0xf0] sm:$0xff]   ;;  %s1916_s30 = scalar_lea.vmem %s1972_s3, %s1206_s27 }
  0x10   : > { %1507 = vmatprep.subr.bf16.mxu1 %v1537_v6  ;;  %1301 = vmatprep.subr.bf16.mxu0 %v1537_v6  ;;  %s1705_s9 = scalar_lea.vmem %s1969_s0, %s1520_s29  ;;  %v1584_v45 = vld [vmem:[%s1970_s1 + $0x120] sm:$0xff]   ;;  %v1590_v50 = vld [vmem:[%s1970_s1 + $0x128] sm:$0xff]   ;;  %v1588_v53 = vld [vmem:[%s1970_s1 + $0xb0] sm:$0xff]  }
  0x11   : > { %v1549_v11 = vld [vmem:[%s1705_s9 + $0xa4] ss:$20 sps:$4 sm:$0xff]   ;;  %v1547_v18 = vld [vmem:[%s1705_s9 + $0xa0] ss:$20 sps:$4 sm:$0xff]   ;;  %v1556_v28 = vld [vmem:[%s1705_s9 + $0xc8] ss:$20 sps:$4 sm:$0xff]  }
  0x12   : > { %857 = vmatprep.mubr.bf16.mxu1 %v1549_v11  ;;  %v1559_v15 = vld [vmem:[%s1705_s9 + $0x4] ss:$20 sps:$4 sm:$0xff]   ;;  %v1557_v21 = vld [vmem:[%s1705_s9] ss:$20 sps:$4 sm:$0xff]   ;;  %v1571_v33 = vld [vmem:[%s1705_s9 + $0x28] ss:$20 sps:$4 sm:$0xff]  }
  0x13   : > { %1515 = vmatpush3.bf16.msra.mxu1 %v1538_v7  ;;  %1302 = vmatpush3.bf16.msra.mxu0 %v1538_v7  ;;  %v1554_v22 = vld [vmem:[%s1705_s9 + $0xcc] ss:$20 sps:$4 sm:$0xff]   ;;  %v1563_v32 = vld [vmem:[%s1705_s9 + $0xf4] ss:$20 sps:$4 sm:$0xff]   ;;  %v1566_v40 = vld [vmem:[%s1705_s9 + $0xf0] ss:$20 sps:$4 sm:$0xff]  }
  0x14   : > { %1508 = vmatprep.subr.bf16.mxu1 %v1539_v8  ;;  %1303 = vmatprep.subr.bf16.mxu0 %v1539_v8  ;;  %v1569_v26 = vld [vmem:[%s1705_s9 + $0x2c] ss:$20 sps:$4 sm:$0xff]   ;;  %v1580_v36 = vld [vmem:[%s1705_s9 + $0x54] ss:$20 sps:$4 sm:$0xff]   ;;  %v1583_v42 = vld [vmem:[%s1705_s9 + $0x50] ss:$20 sps:$4 sm:$0xff]  }
  0x15   : > { %825 = vmatprep.mubr.bf16.mxu0 %v1559_v15  ;;  %v1575_v43 = vld [vmem:[%s1705_s9 + $0x11c] ss:$20 sps:$4 sm:$0xff]   ;;  %v1577_v49 = vld [vmem:[%s1705_s9 + $0x118] ss:$20 sps:$4 sm:$0xff]   ;;  %v1589_v58 = vld [vmem:[%s1705_s9 + $0x140] ss:$20 sps:$4 sm:$0xff]  }
  0x16   : > { %v1591_v46 = vld [vmem:[%s1705_s9 + $0x7c] ss:$20 sps:$4 sm:$0xff]   ;;  %v1586_v51 = vld [vmem:[%s1705_s9 + $0x144] ss:$20 sps:$4 sm:$0xff]   ;;  %v1599_v59 = vld [vmem:[%s1705_s9 + $0xc] ss:$20 sps:$4 sm:$0xff]  }
  0x17   : > { %1516 = vmatpush3.bf16.msra.mxu1 %v1540_v9  ;;  %1304 = vmatpush3.bf16.msra.mxu0 %v1540_v9  ;;  %v1593_v52 = vld [vmem:[%s1705_s9 + $0x78] ss:$20 sps:$4 sm:$0xff]   ;;  %v1596_v55 = vld [vmem:[%s1970_s1 + $0x130] sm:$0xff]   ;;  %v1597_v61 = vld [vmem:[%s1705_s9 + $0x8] ss:$20 sps:$4 sm:$0xff]  }
  0x18   : > { %1509 = vmatprep.subr.bf16.mxu1 %v1541_v10  ;;  %1305 = vmatprep.subr.bf16.mxu0 %v1541_v10  ;;  %v1594_v54 = vld [vmem:[%s1970_s1 + $0xf8] sm:$0xff]   ;;  %v1601_v60 = vld [vmem:[%s1705_s9 + $0x10] ss:$20 sps:$4 sm:$0xff]   ;;  %v1602_v62 = vld [vmem:[%s1705_s9 + $0x34] ss:$20 sps:$4 sm:$0xff]  }
  0x19   : > { %v1595_v56 = vld [vmem:[%s1970_s1 + $0xb8] sm:$0xff]   ;;  %v1604_v0 = vld [vmem:[%s1705_s9 + $0x30] ss:$20 sps:$4 sm:$0xff]   ;;  %v1609_v2 = vld [vmem:[%s1705_s9 + $0x60] ss:$20 sps:$4 sm:$0xff]  }
  0x1a   : > { %v1600_v57 = vld [vmem:[%s1970_s1 + $0x138] sm:$0xff]   ;;  %v1612_v6 = vld [vmem:[%s1705_s9 + $0x80] ss:$20 sps:$4 sm:$0xff]   ;;  %v1617_v8 = vld [vmem:[%s1705_s9 + $0xb0] ss:$20 sps:$4 sm:$0xff]  }
  0x1b   : > { %1517 = vmatpush3.bf16.msra.mxu1 %v1542_v12  ;;  %1306 = vmatpush3.bf16.msra.mxu0 %v1542_v12  ;;  %v1605_v63 = vld [vmem:[%s1705_s9 + $0x38] ss:$20 sps:$4 sm:$0xff]   ;;  %v1606_v1 = vld [vmem:[%s1705_s9 + $0x5c] ss:$20 sps:$4 sm:$0xff]   ;;  %v1618_v10 = vld [vmem:[%s1705_s9 + $0xd4] ss:$20 sps:$4 sm:$0xff]  }
  0x1c   : > { %1510 = vmatprep.subr.bf16.mxu1 %v1543_v13  ;;  %1307 = vmatprep.subr.bf16.mxu0 %v1543_v13  ;;  %v1608_v3 = vld [vmem:[%s1705_s9 + $0x58] ss:$20 sps:$4 sm:$0xff]   ;;  %v1613_v5 = vld [vmem:[%s1705_s9 + $0x88] ss:$20 sps:$4 sm:$0xff]   ;;  %v1620_v12 = vld [vmem:[%s1705_s9 + $0xd0] ss:$20 sps:$4 sm:$0xff]  }
  0x1d   : > { %v1610_v4 = vld [vmem:[%s1705_s9 + $0x84] ss:$20 sps:$4 sm:$0xff]   ;;  %v1614_v7 = vld [vmem:[%s1705_s9 + $0xac] ss:$20 sps:$4 sm:$0xff]   ;;  %v1616_v9 = vld [vmem:[%s1705_s9 + $0xa8] ss:$20 sps:$4 sm:$0xff]  }
  0x1e   : > { %v1621_v11 = vld [vmem:[%s1705_s9 + $0xd8] ss:$20 sps:$4 sm:$0xff]   ;;  %v1622_v13 = vld [vmem:[%s1705_s9 + $0xfc] ss:$20 sps:$4 sm:$0xff]  }
  0x1f   : > { %1518 = vmatpush3.bf16.msra.mxu1 %v1544_v14  ;;  %1308 = vmatpush3.bf16.msra.mxu0 %v1544_v14  ;;  %v1625_v14 = vld [vmem:[%s1705_s9 + $0x100] ss:$20 sps:$4 sm:$0xff]   ;;  %v1624_v15 = vld [vmem:[%s1705_s9 + $0xf8] ss:$20 sps:$4 sm:$0xff]  }
  0x20   : > { %1511 = vmatprep.subr.bf16.mxu1 %v1545_v16  ;;  %1309 = vmatprep.subr.bf16.mxu0 %v1545_v16  ;;  %v1626_v16 = vld [vmem:[%s1705_s9 + $0x124] ss:$20 sps:$4 sm:$0xff]  }
  0x23   : > { %1519 = vmatpush3.bf16.msra.mxu1 %v1546_v17  ;;  %1310 = vmatpush3.bf16.msra.mxu0 %v1546_v17  ;;  %v1629_v17 = vld [vmem:[%s1705_s9 + $0x128] ss:$20 sps:$4 sm:$0xff]  }
  0x24   : > { %1365 = vmatprep.subr.bf16.mxu1 %v1550_v19  ;;  %1452 = vmatprep.subr.bf16.mxu0 %v1642_v24  ;;  %v1630_v19 = vld [vmem:[%s1705_s9 + $0x14c] ss:$20 sps:$4 sm:$0xff]  }
  0x26   : > { %858 = vmatmul.mubr.bf16.vlgmr.msra.gmra.mrb[0].mxu1 %v1547_v18  ;;  %826 = vmatmul.mubr.bf16.vlgmr.msra.gmra.mrb[0].mxu0 %v1557_v21  ;;  %v1628_v18 = vld [vmem:[%s1705_s9 + $0x120] ss:$20 sps:$4 sm:$0xff]   ;;  %v1632_v21 = vld [vmem:[%s1705_s9 + $0x148] ss:$20 sps:$4 sm:$0xff]  }
  0x27   : > { %1366 = vmatpush3.bf16.msra.mxu1 %v1551_v20  ;;  %865 = vmatprep.mubr.bf16.mxu1 %v1554_v22  ;;  %v1633_v20 = vld [vmem:[%s1705_s9 + $0x150] ss:$20 sps:$4 sm:$0xff]  }
  0x28   : > { %1367 = vmatprep.subr.bf16.mxu1 %v1552_v23  ;;  %1453 = vmatpush3.bf16.msra.mxu0 %v1562_v25 }
  0x29   : > { %1454 = vmatprep.subr.bf16.mxu0 %v1642_v24  ;;  %833 = vmatprep.mubr.bf16.mxu0 %v1569_v26 }
  0x2b   : > { %1368 = vmatpush3.bf16.msra.mxu1 %v1553_v27 }
  0x2c   : > { %1369 = vmatprep.subr.bf16.mxu1 %v1560_v29  ;;  %1455 = vmatpush3.bf16.msra.mxu0 %v1568_v30 }
  0x2d   : > { %1456 = vmatprep.subr.bf16.mxu0 %v1642_v24 }
  0x2e   : > { %866 = vmatmul.mubr.bf16.gmra.mrb[4].mxu1 %v1556_v28  ;;  %834 = vmatmul.mubr.bf16.gmra.mrb[4].mxu0 %v1571_v33 }
  0x2f   : > { %1370 = vmatpush3.bf16.msra.mxu1 %v1561_v31  ;;  %873 = vmatprep.mubr.bf16.mxu1 %v1563_v32 }
  0x30   : > { %1371 = vmatprep.subr.bf16.mxu1 %v1565_v34  ;;  %1457 = vmatpush3.bf16.msra.mxu0 %v1573_v35 }
  0x31   : > { %1458 = vmatprep.subr.bf16.mxu0 %v1642_v24  ;;  %841 = vmatprep.mubr.bf16.mxu0 %v1580_v36 }
  0x33   : > { %1372 = vmatpush3.bf16.msra.mxu1 %v1567_v37 }
  0x34   : > { %1373 = vmatprep.subr.bf16.mxu1 %v1572_v38  ;;  %1459 = vmatpush3.bf16.msra.mxu0 %v1578_v39 }
  0x35   : > { %1460 = vmatprep.subr.bf16.mxu0 %v1642_v24 }
  0x36   : > { %874 = vmatmul.mubr.bf16.gmra.mrb[8].mxu1 %v1566_v40  ;;  %842 = vmatmul.mubr.bf16.gmra.mrb[8].mxu0 %v1583_v42 }
  0x37   : > { %1374 = vmatpush3.bf16.msra.mxu1 %v1574_v41  ;;  %881 = vmatprep.mubr.bf16.mxu1 %v1575_v43 }
  0x38   : > { %1375 = vmatprep.subr.bf16.mxu1 %v1579_v44  ;;  %1461 = vmatpush3.bf16.msra.mxu0 %v1584_v45 }
  0x39   : > { %1462 = vmatprep.subr.bf16.mxu0 %v1642_v24  ;;  %849 = vmatprep.mubr.bf16.mxu0 %v1591_v46 }
  0x3b   : > { %1376 = vmatpush3.bf16.msra.mxu1 %v1582_v47 }
  0x3c   : > { %1377 = vmatprep.subr.bf16.mxu1 %v1585_v48  ;;  %1463 = vmatpush3.bf16.msra.mxu0 %v1590_v50 }
  0x3d   : > { %1464 = vmatprep.subr.bf16.mxu0 %v1642_v24 }
  0x3e   : > { %882 = vmatmul.mubr.bf16.gmra.mrb[12].mxu1 %v1577_v49  ;;  %850 = vmatmul.mubr.bf16.gmra.mrb[12].mxu0 %v1593_v52 }
  0x3f   : > { %889 = vmatprep.mubr.bf16.mxu1 %v1586_v51  ;;  %1378 = vmatpush3.bf16.msra.mxu1 %v1588_v53 }
  0x40   : > { %1379 = vmatprep.subr.bf16.mxu1 %v1594_v54  ;;  %1465 = vmatpush3.bf16.msra.mxu0 %v1596_v55 }
  0x41   : > { %1466 = vmatprep.subr.bf16.mxu0 %v1642_v24  ;;  %1468 = vmatprep.mubr.msk.bf16.mxu0 %vm1643_vm0, %v1642_v24 }
  0x43   : > { %1380 = vmatpush3.bf16.msra.mxu1 %v1595_v56 }
  0x44   : > { %1467 = vmatpush3.bf16.msra.mxu0 %v1600_v57 }
  0x46   : > { %890 = vmatmul.mubr.bf16.gmra.mrb[16].mxu1 %v1589_v58 }
  0x47   : > { %930 = vmatprep.mubr.bf16.mxu1 %v1599_v59  ;;  %1469 = vmatmul.mubr.bf16.vlgmr.msra.gmra.mrb[16].mxu0 %v1601_v60 }
  0x48   : > { %1472 = vmatprep.mubr.msk.bf16.mxu0 %vm1643_vm0, %v1642_v24 }
  0x4e   : > { %931 = vmatmul.mubr.bf16.vlgmr.msra.gmra.mrb[20].mxu1 %v1597_v61 }
  0x4f   : > { %938 = vmatprep.mubr.bf16.mxu1 %v1602_v62  ;;  %1473 = vmatmul.mubr.bf16.gmra.mrb[20].mxu0 %v1605_v63 }
  0x50   : > { %1476 = vmatprep.mubr.msk.bf16.mxu0 %vm1643_vm0, %v1642_v24 }
  0x56   : > { %939 = vmatmul.mubr.bf16.gmra.mrb[24].mxu1 %v1604_v0 }
  0x57   : > { %946 = vmatprep.mubr.bf16.mxu1 %v1606_v1  ;;  %1477 = vmatmul.mubr.bf16.gmra.mrb[24].mxu0 %v1609_v2 }
  0x58   : > { %1480 = vmatprep.mubr.msk.bf16.mxu0 %vm1643_vm0, %v1642_v24 }
  0x5e   : > { %947 = vmatmul.mubr.bf16.gmra.mrb[28].mxu1 %v1608_v3 }
  0x5f   : > { %954 = vmatprep.mubr.bf16.mxu1 %v1610_v4  ;;  %1481 = vmatmul.mubr.bf16.gmra.mrb[28].mxu0 %v1613_v5 }
  0x60   : > { %1484 = vmatprep.mubr.msk.bf16.mxu0 %vm1643_vm0, %v1642_v24 }
  0x66   : > { %955 = vmatmul.mubr.bf16.gmra.mrb[32].mxu1 %v1612_v6 }
  0x67   : > { %962 = vmatprep.mubr.bf16.mxu1 %v1614_v7  ;;  %1485 = vmatmul.mubr.bf16.gmra.mrb[32].mxu0 %v1617_v8 }
  0x68   : > { %1488 = vmatprep.mubr.msk.bf16.mxu0 %vm1643_vm0, %v1642_v24 }
  0x6e   : > { %963 = vmatmul.mubr.bf16.gmra.mrb[36].mxu1 %v1616_v9 }
  0x6f   : > { %970 = vmatprep.mubr.bf16.mxu1 %v1618_v10  ;;  %1489 = vmatmul.mubr.bf16.gmra.mrb[36].mxu0 %v1621_v11 }
  0x70   : > { %1492 = vmatprep.mubr.msk.bf16.mxu0 %vm1643_vm0, %v1642_v24 }
  0x76   : > { %971 = vmatmul.mubr.bf16.gmra.mrb[40].mxu1 %v1620_v12  ;;  %v1902_v12 = vld [vmem:[%s1971_s2] ss:$0 sm:$0xff] }
  0x77   : > { %978 = vmatprep.mubr.bf16.mxu1 %v1622_v13  ;;  %1493 = vmatmul.mubr.bf16.gmra.mrb[40].mxu0 %v1625_v14 }
  0x78   : > { %1496 = vmatprep.mubr.msk.bf16.mxu0 %vm1643_vm0, %v1642_v24 }
  0x7e   : > { %979 = vmatmul.mubr.bf16.gmra.mrb[44].mxu1 %v1624_v15 }
  0x7f   : > { %986 = vmatprep.mubr.bf16.mxu1 %v1626_v16  ;;  %1497 = vmatmul.mubr.bf16.gmra.mrb[44].mxu0 %v1629_v17 }
  0x80   : > { %1500 = vmatprep.mubr.msk.bf16.mxu0 %vm1643_vm0, %v1642_v24 }
  0x86   : > { %987 = vmatmul.mubr.bf16.gmra.mrb[48].mxu1 %v1628_v18 }
  0x87   : > { %994 = vmatprep.mubr.bf16.mxu1 %v1630_v19  ;;  %1501 = vmatmul.mubr.bf16.gmra.mrb[48].mxu0 %v1633_v20 }
  0x8e   : > { %995 = vmatmul.mubr.bf16.gmra.mrb[52].mxu1 %v1632_v21 }
  0xf9   : > { %v1335_v22 = vpop.f32.mrb[0].mxu1  ;;  %v1311_v23 = vpop.f32.mrb[0].mxu0 }
  0xfa   : > { %v1336_v25 = vpop.f32.mrb[1].mxu1  ;;  %v1312_v26 = vpop.f32.mrb[1].mxu0 }
  0xfb   : > { %v1871_v27 = vadd.f32 %v1336_v25, %v1335_v22  ;;  %v1338_v28 = vpop.f32.mrb[2].mxu1  ;;  %v1313_v29 = vadd.f32 %v1312_v26, %v1311_v23  ;;  %v1314_v30 = vpop.f32.mrb[2].mxu0 }
  0xfc   : > { %v1339_v31 = vpop.f32.mrb[3].mxu1  ;;  %v1315_v32 = vpop.f32.mrb[3].mxu0 }
  0xfd   : > { %v1873_v24 = vadd.f32 %v1339_v31, %v1338_v28  ;;  %v1316_v33 = vadd.f32 %v1315_v32, %v1314_v30  ;;  %v828_v22 = vadd.f32 %v1313_v29, %v1902_v12 }
  0xff   : > { %v831_v31 = vadd.f32 %v1316_v33, %v1902_v12 }
 0x101   : > { %v1341_v34 = vpop.f32.mrb[4].mxu1  ;;  %v1317_v35 = vpop.f32.mrb[4].mxu0 }
 0x102   : > { %v1342_v36 = vpop.f32.mrb[5].mxu1  ;;  %v1318_v37 = vpop.f32.mrb[5].mxu0 }
 0x103   : > { %v1875_v38 = vadd.f32 %v1342_v36, %v1341_v34  ;;  %v1344_v39 = vpop.f32.mrb[6].mxu1  ;;  %v1877_v40 = vadd.f32 %v1318_v37, %v1317_v35  ;;  %v1320_v41 = vpop.f32.mrb[6].mxu0 }
 0x104   : > { %v1345_v42 = vpop.f32.mrb[7].mxu1  ;;  %v1321_v43 = vpop.f32.mrb[7].mxu0 }
 0x105   : > { %v1879_v44 = vadd.f32 %v1345_v42, %v1344_v39  ;;  %v1881_v45 = vadd.f32 %v1321_v43, %v1320_v41  ;;  %v836_v33 = vadd.f32 %v1877_v40, %v1902_v12 }
 0x109   : > { %v1347_v46 = vpop.f32.mrb[8].mxu1  ;;  %v1323_v47 = vpop.f32.mrb[8].mxu0 }
 0x10a   : > { %v1348_v48 = vpop.f32.mrb[9].mxu1  ;;  %v1324_v49 = vpop.f32.mrb[9].mxu0 }
 0x10b   : > { %v1883_v50 = vadd.f32 %v1348_v48, %v1347_v46  ;;  %v1350_v51 = vpop.f32.mrb[10].mxu1  ;;  %v1885_v52 = vadd.f32 %v1324_v49, %v1323_v47  ;;  %v1326_v53 = vpop.f32.mrb[10].mxu0 }
 0x10c   : > { %v1351_v54 = vpop.f32.mrb[11].mxu1  ;;  %v1327_v55 = vpop.f32.mrb[11].mxu0 }
 0x10d   : > { %v1887_v56 = vadd.f32 %v1351_v54, %v1350_v51  ;;  %v1889_v57 = vadd.f32 %v1327_v55, %v1326_v53  ;;  %v839_v54 = vadd.f32 %v1881_v45, %v1902_v12 }
 0x111   : > { %v1353_v58 = vpop.f32.mrb[12].mxu1  ;;  %v1329_v59 = vpop.f32.mrb[12].mxu0 }
 0x112   : > { %v1354_v60 = vpop.f32.mrb[13].mxu1  ;;  %v1330_v61 = vpop.f32.mrb[13].mxu0 }
 0x113   : > { %v1891_v62 = vadd.f32 %v1354_v60, %v1353_v58  ;;  %v1356_v63 = vpop.f32.mrb[14].mxu1  ;;  %v1893_v0 = vadd.f32 %v1330_v61, %v1329_v59  ;;  %v1332_v1 = vpop.f32.mrb[14].mxu0 }
 0x114   : > { %v1357_v2 = vpop.f32.mrb[15].mxu1  ;;  %v1333_v3 = vpop.f32.mrb[15].mxu0 }
 0x115   : > { %v1895_v4 = vadd.f32 %v1357_v2, %v1356_v63  ;;  %v1897_v5 = vadd.f32 %v1333_v3, %v1332_v1 }
 0x119   : > { %v1359_v6 = vpop.f32.mrb[16].mxu1 }
 0x11a   : > { %v1360_v7 = vpop.f32.mrb[17].mxu1  ;;  %v1037_v8 = vpop.f32.mrb[16].mxu0 }
 0x11b   : > { %v1361_v9 = vadd.f32 %v1360_v7, %v1359_v6  ;;  %v1362_v10 = vpop.f32.mrb[18].mxu1  ;;  %v1470_v11 = vpop.f32.mrb[17].mxu0  ;;  %v844_v6 = vadd.f32 %v1885_v52, %v1902_v12 }
 0x11c   : > { %v1363_v13 = vpop.f32.mrb[19].mxu1  ;;  %v1040_v14 = vpop.f32.mrb[18].mxu0 }
 0x11d   : > { %v1905_v15 = vadd.f32 %v1361_v9, %v1902_v12  ;;  %v1364_v16 = vadd.f32 %v1363_v13, %v1362_v10  ;;  %v1471_v17 = vpop.f32.mrb[19].mxu0  ;;  %v847_v13 = vadd.f32 %v1889_v57, %v1902_v12 }
 0x11f   : > { %v1908_v18 = vadd.f32 %v1364_v16, %v1902_v12 }
 0x121   : > { %v1381_v19 = vpop.f32.mrb[20].mxu1 }
 0x122   : > { %v1382_v20 = vpop.f32.mrb[21].mxu1  ;;  %v1045_v21 = vpop.f32.mrb[20].mxu0 }
 0x123   : > { %v1383_v23 = vadd.f32 %v1382_v20, %v1381_v19  ;;  %v1384_v25 = vpop.f32.mrb[22].mxu1  ;;  %v1474_v26 = vpop.f32.mrb[21].mxu0 }
 0x124   : > { %v1385_v28 = vpop.f32.mrb[23].mxu1  ;;  %v1048_v30 = vpop.f32.mrb[22].mxu0  ;;  %v852_v26 = vadd.f32 %v1893_v0, %v1902_v12 }
 0x125   : > { %v1386_v32 = vadd.f32 %v1385_v28, %v1384_v25  ;;  %v933_v34 = vadd.f32 %v1383_v23, %v828_v22  ;;  %v1475_v35 = vpop.f32.mrb[23].mxu0 }
 0x126   : > { %v855_v35 = vadd.f32 %v1897_v5, %v1902_v12 }
 0x127   : > { %v1038_v36 = vadd.f32 %v1037_v8, %v933_v34  ;;  %v936_v37 = vadd.f32 %v1386_v32, %v831_v31 }
 0x129   : > { %v1108_v29 = vmax.f32 %v1038_v36, 0.0  ;;  %v1041_v39 = vadd.f32 %v1040_v14, %v936_v37  ;;  %v1387_v41 = vpop.f32.mrb[24].mxu1 }
 0x12a   : > { %v1388_v42 = vpop.f32.mrb[25].mxu1  ;;  %v1053_v43 = vpop.f32.mrb[24].mxu0 }
 0x12b   : > { %1126 = vst [vmem:[%s1916_s30] sm:$0xff] %v1108_v29  ;;  %v1109_v46 = vmax.f32 %v1041_v39, 0.0  ;;  %v1389_v47 = vadd.f32 %v1388_v42, %v1387_v41  ;;  %v1390_v48 = vpop.f32.mrb[26].mxu1  ;;  %v1478_v49 = vpop.f32.mrb[25].mxu0 }
 0x12c   : > { %v1391_v51 = vpop.f32.mrb[27].mxu1  ;;  %v1056_v53 = vpop.f32.mrb[26].mxu0 }
 0x12d   : > { %1127 = vst [vmem:[%s1916_s30 + $0x8] sm:$0xff] %v1109_v46  ;;  %v1392_v55 = vadd.f32 %v1391_v51, %v1390_v48  ;;  %v941_v58 = vadd.f32 %v1389_v47, %v836_v33  ;;  %v1479_v59 = vpop.f32.mrb[27].mxu0  ;;  %v860_v47 = vadd.f32 %v1871_v27, %v1902_v12 }
 0x12f   : > { %v1046_v60 = vadd.f32 %v1045_v21, %v941_v58  ;;  %v944_v61 = vadd.f32 %v1392_v55, %v839_v54  ;;  %v863_v55 = vadd.f32 %v1873_v24, %v1902_v12 }
 0x131   : > { %v1110_v63 = vmax.f32 %v1046_v60, 0.0  ;;  %v1049_v40 = vadd.f32 %v1048_v30, %v944_v61  ;;  %v1393_v1 = vpop.f32.mrb[28].mxu1 }
 0x132   : > { %v1394_v2 = vpop.f32.mrb[29].mxu1  ;;  %v1061_v3 = vpop.f32.mrb[28].mxu0 }
 0x133   : > { %1128 = vst [vmem:[%s1916_s30 + $0x10] sm:$0xff] %v1110_v63  ;;  %v1111_v7 = vmax.f32 %v1049_v40, 0.0  ;;  %v1395_v8 = vadd.f32 %v1394_v2, %v1393_v1  ;;  %v1396_v9 = vpop.f32.mrb[30].mxu1  ;;  %v1482_v45 = vpop.f32.mrb[29].mxu0 }
 0x134   : > { %v1397_v10 = vpop.f32.mrb[31].mxu1  ;;  %v1064_v11 = vpop.f32.mrb[30].mxu0 }
 0x135   : > { %1129 = vst [vmem:[%s1916_s30 + $0x18] sm:$0xff] %v1111_v7  ;;  %v1398_v14 = vadd.f32 %v1397_v10, %v1396_v9  ;;  %v949_v16 = vadd.f32 %v1395_v8, %v844_v6  ;;  %v1483_v17 = vpop.f32.mrb[31].mxu0  ;;  %v868_v6 = vadd.f32 %v1875_v38, %v1902_v12 }
 0x137   : > { %v1054_v19 = vadd.f32 %v1053_v43, %v949_v16  ;;  %v952_v20 = vadd.f32 %v1398_v14, %v847_v13 }
 0x139   : > { %v1112_v21 = vmax.f32 %v1054_v19, 0.0  ;;  %v1057_v52 = vadd.f32 %v1056_v53, %v952_v20  ;;  %v1399_v22 = vpop.f32.mrb[32].mxu1 }
 0x13a   : > { %v1400_v23 = vpop.f32.mrb[33].mxu1  ;;  %v1069_v25 = vpop.f32.mrb[32].mxu0 }
 0x13b   : > { %1130 = vst [vmem:[%s1916_s30 + $0x20] sm:$0xff] %v1112_v21  ;;  %v1113_v28 = vmax.f32 %v1057_v52, 0.0  ;;  %v1401_v30 = vadd.f32 %v1400_v23, %v1399_v22  ;;  %v1402_v31 = vpop.f32.mrb[34].mxu1  ;;  %v1486_v57 = vpop.f32.mrb[33].mxu0  ;;  %v876_v23 = vadd.f32 %v1883_v50, %v1902_v12 }
 0x13c   : > { %v1403_v32 = vpop.f32.mrb[35].mxu1  ;;  %v1072_v34 = vpop.f32.mrb[34].mxu0  ;;  %v879_v57 = vadd.f32 %v1887_v56, %v1902_v12 }
 0x13d   : > { %1131 = vst [vmem:[%s1916_s30 + $0x28] sm:$0xff] %v1113_v28  ;;  %v1404_v36 = vadd.f32 %v1403_v32, %v1402_v31  ;;  %v957_v37 = vadd.f32 %v1401_v30, %v852_v26  ;;  %v1487_v29 = vpop.f32.mrb[35].mxu0 }
 0x13f   : > { %v1062_v39 = vadd.f32 %v1061_v3, %v957_v37  ;;  %v960_v41 = vadd.f32 %v1404_v36, %v855_v35 }
 0x141   : > { %v1114_v42 = vmax.f32 %v1062_v39, 0.0  ;;  %v1065_v0 = vadd.f32 %v1064_v11, %v960_v41  ;;  %v1405_v43 = vpop.f32.mrb[36].mxu1  ;;  %v871_v11 = vadd.f32 %v1879_v44, %v1902_v12 }
 0x142   : > { %v1406_v33 = vpop.f32.mrb[37].mxu1  ;;  %v1077_v46 = vpop.f32.mrb[36].mxu0 }
 0x143   : > { %1132 = vst [vmem:[%s1916_s30 + $0x30] sm:$0xff] %v1114_v42  ;;  %v1115_v48 = vmax.f32 %v1065_v0, 0.0  ;;  %v1407_v49 = vadd.f32 %v1406_v33, %v1405_v43  ;;  %v1408_v51 = vpop.f32.mrb[38].mxu1  ;;  %v1490_v5 = vpop.f32.mrb[37].mxu0  ;;  %v884_v0 = vadd.f32 %v1891_v62, %v1902_v12 }
 0x144   : > { %v1409_v53 = vpop.f32.mrb[39].mxu1  ;;  %v1080_v54 = vpop.f32.mrb[38].mxu0 }
 0x145   : > { %1133 = vst [vmem:[%s1916_s30 + $0x38] sm:$0xff] %v1115_v48  ;;  %v1410_v58 = vadd.f32 %v1409_v53, %v1408_v51  ;;  %v965_v59 = vadd.f32 %v1407_v49, %v860_v47  ;;  %v1491_v60 = vpop.f32.mrb[39].mxu0  ;;  %v887_v49 = vadd.f32 %v1895_v4, %v1902_v12 }
 0x147   : > { %v1070_v61 = vadd.f32 %v1069_v25, %v965_v59  ;;  %v968_v63 = vadd.f32 %v1410_v58, %v863_v55 }
 0x149   : > { %v1116_v40 = vmax.f32 %v1070_v61, 0.0  ;;  %v1073_v27 = vadd.f32 %v1072_v34, %v968_v63  ;;  %v1411_v1 = vpop.f32.mrb[40].mxu1 }
 0x14a   : > { %v1412_v2 = vpop.f32.mrb[41].mxu1  ;;  %v1085_v3 = vpop.f32.mrb[40].mxu0 }
 0x14b   : > { %1134 = vst [vmem:[%s1916_s30 + $0x40] sm:$0xff] %v1116_v40  ;;  %v1117_v7 = vmax.f32 %v1073_v27, 0.0  ;;  %v1413_v8 = vadd.f32 %v1412_v2, %v1411_v1  ;;  %v1414_v9 = vpop.f32.mrb[42].mxu1  ;;  %v1494_v24 = vpop.f32.mrb[41].mxu0 }
 0x14c   : > { %v1415_v45 = vpop.f32.mrb[43].mxu1  ;;  %v1088_v10 = vpop.f32.mrb[42].mxu0 }
 0x14d   : > { %1135 = vst [vmem:[%s1916_s30 + $0x48] sm:$0xff] %v1117_v7  ;;  %v1416_v13 = vadd.f32 %v1415_v45, %v1414_v9  ;;  %v973_v14 = vadd.f32 %v1413_v8, %v868_v6  ;;  %v1495_v16 = vpop.f32.mrb[43].mxu0 }
 0x14f   : > { %v1078_v17 = vadd.f32 %v1077_v46, %v973_v14  ;;  %v976_v19 = vadd.f32 %v1416_v13, %v871_v11 }
 0x151   : > { %v1118_v20 = vmax.f32 %v1078_v17, 0.0  ;;  %v1081_v38 = vadd.f32 %v1080_v54, %v976_v19  ;;  %v1417_v21 = vpop.f32.mrb[44].mxu1 }
 0x152   : > { %v1418_v52 = vpop.f32.mrb[45].mxu1  ;;  %v1093_v22 = vpop.f32.mrb[44].mxu0 }
 0x153   : > { %1136 = vst [vmem:[%s1916_s30 + $0x50] sm:$0xff] %v1118_v20  ;;  %v1119_v25 = vmax.f32 %v1081_v38, 0.0  ;;  %v1419_v26 = vadd.f32 %v1418_v52, %v1417_v21  ;;  %v1420_v28 = vpop.f32.mrb[46].mxu1  ;;  %v1498_v44 = vpop.f32.mrb[45].mxu0 }
 0x154   : > { %v1421_v30 = vpop.f32.mrb[47].mxu1  ;;  %v1096_v31 = vpop.f32.mrb[46].mxu0 }
 0x155   : > { %1137 = vst [vmem:[%s1916_s30 + $0x58] sm:$0xff] %v1119_v25  ;;  %v1422_v32 = vadd.f32 %v1421_v30, %v1420_v28  ;;  %v981_v34 = vadd.f32 %v1419_v26, %v876_v23  ;;  %v1499_v35 = vpop.f32.mrb[47].mxu0 }
 0x157   : > { %v1086_v36 = vadd.f32 %v1085_v3, %v981_v34  ;;  %v984_v37 = vadd.f32 %v1422_v32, %v879_v57 }
 0x159   : > { %v1120_v29 = vmax.f32 %v1086_v36, 0.0  ;;  %v1089_v50 = vadd.f32 %v1088_v10, %v984_v37  ;;  %v1423_v39 = vpop.f32.mrb[48].mxu1 }
 0x15a   : > { %v1424_v41 = vpop.f32.mrb[49].mxu1  ;;  %v1101_v42 = vpop.f32.mrb[48].mxu0 }
 0x15b   : > { %1138 = vst [vmem:[%s1916_s30 + $0x60] sm:$0xff] %v1120_v29  ;;  %v1121_v43 = vmax.f32 %v1089_v50, 0.0  ;;  %v1425_v33 = vadd.f32 %v1424_v41, %v1423_v39  ;;  %v1426_v56 = vpop.f32.mrb[50].mxu1  ;;  %v1502_v46 = vpop.f32.mrb[49].mxu0 }
 0x15c   : > { %v1427_v47 = vpop.f32.mrb[51].mxu1  ;;  %v1104_v48 = vpop.f32.mrb[50].mxu0 }
 0x15d   : > { %1139 = vst [vmem:[%s1916_s30 + $0x68] sm:$0xff] %v1121_v43  ;;  %v1428_v51 = vadd.f32 %v1427_v47, %v1426_v56  ;;  %v989_v5 = vadd.f32 %v1425_v33, %v884_v0  ;;  %v1503_v53 = vpop.f32.mrb[51].mxu0 }
 0x15f   : > { %v1094_v54 = vadd.f32 %v1093_v22, %v989_v5  ;;  %v992_v55 = vadd.f32 %v1428_v51, %v887_v49 }
 0x161   : > { %v1122_v58 = vmax.f32 %v1094_v54, 0.0  ;;  %v1097_v62 = vadd.f32 %v1096_v31, %v992_v55  ;;  %v1429_v59 = vpop.f32.mrb[52].mxu1 }
 0x162   : > { %v1430_v60 = vpop.f32.mrb[53].mxu1 }
 0x163   : > { %1140 = vst [vmem:[%s1916_s30 + $0x70] sm:$0xff] %v1122_v58  ;;  %v1123_v61 = vmax.f32 %v1097_v62, 0.0  ;;  %v1431_v63 = vadd.f32 %v1430_v60, %v1429_v59  ;;  %v1432_v40 = vpop.f32.mrb[54].mxu1 }
 0x164   : > { %v1433_v27 = vpop.f32.mrb[55].mxu1 }
 0x165   : > { %1141 = vst [vmem:[%s1916_s30 + $0x78] sm:$0xff] %v1123_v61  ;;  %v1434_v4 = vadd.f32 %v1433_v27, %v1432_v40  ;;  %v997_v12 = vadd.f32 %v1431_v63, %v1905_v15 }
 0x167   : > { %v1102_v1 = vadd.f32 %v1101_v42, %v997_v12  ;;  %v1000_v2 = vadd.f32 %v1434_v4, %v1908_v18 }
 0x169   : > { %v1124_v3 = vmax.f32 %v1102_v1, 0.0  ;;  %v1105_v6 = vadd.f32 %v1104_v48, %v1000_v2 }
 0x16b   : > { %1142 = vst [vmem:[%s1916_s30 + $0x80] sm:$0xff] %v1124_v3  ;;  %v1125_v7 = vmax.f32 %v1105_v6, 0.0 }
 0x16d   : > { %1143 = vst [vmem:[%s1916_s30 + $0x88] sm:$0xff] %v1125_v7 }
 0x16e PF: > { %s13_s12 = sadd.s32 1, %s1640_s12  }
 0x16f   : > { %p10_p4 = scmp.ge.s32.totalorder %s13_s12, 4  }
 0x171   :  { %12 = sbr.rel (!%p10_p4) target bundleno = 1 (0x1), region = 62 }

// kernel: forward.11
= control target key start
LH: loop header
LB: loop body
LE: loop exit
PB: predicated region body
PF: predicated region fallthrough
CT: control target
= control target key end

     0   :  { %v867_v34 = vmov 0.0   ;;  %vm868_vm0 = vmmov 0   ;;  %s1097_s1 = inlined_call_operand.vmem [shape: bf16[640,128], index: 1, kind: input, shape index: {}]   ;;  %s1098_s0 = inlined_call_operand.vmem [shape: bf16[48,640], index: 0, kind: input, shape index: {}]   ;;  %s1099_s2 = inlined_call_operand.vmem [shape: f32[1,128], index: 2, kind: input, shape index: {}]   ;;  %s1100_s3 = inlined_call_operand.vmem [shape: f32[48,128], index: 3, kind: output, shape index: {}]  }
   0x1   :  { %v806_v0 = vld [vmem:[%s1097_s1 + $0x40] sm:$0xff]   ;;  %v810_v4 = vld [vmem:[%s1097_s1 + $0x48] sm:$0xff]   ;;  %v814_v8 = vld [vmem:[%s1097_s1 + $0x50] sm:$0xff]  }
   0x2   :  { %v807_v1 = vld [vmem:[%s1097_s1 + $0xc0] sm:$0xff]   ;;  %681 = vmatprep.subr.bf16.mxu0 %v806_v0  ;;  %v811_v5 = vld [vmem:[%s1097_s1 + $0xc8] sm:$0xff]   ;;  %v815_v9 = vld [vmem:[%s1097_s1 + $0xd0] sm:$0xff]  }
   0x3   :  { %v808_v2 = vld [vmem:[%s1097_s1] sm:$0xff]   ;;  %715 = vmatprep.subr.bf16.mxu1 %v807_v1  ;;  %v812_v6 = vld [vmem:[%s1097_s1 + $0x8] sm:$0xff]   ;;  %v816_v10 = vld [vmem:[%s1097_s1 + $0x10] sm:$0xff]  }
   0x4   :  { %v809_v3 = vld [vmem:[%s1097_s1 + $0x80] sm:$0xff]   ;;  %682 = vmatpush3.bf16.msra.mxu0 %v808_v2  ;;  %v813_v7 = vld [vmem:[%s1097_s1 + $0x88] sm:$0xff]   ;;  %v817_v11 = vld [vmem:[%s1097_s1 + $0x90] sm:$0xff]  }
   0x5   :  { %716 = vmatpush3.bf16.msra.mxu1 %v809_v3  ;;  %683 = vmatprep.subr.bf16.mxu0 %v810_v4  ;;  %v818_v12 = vld [vmem:[%s1097_s1 + $0x58] sm:$0xff]   ;;  %v822_v16 = vld [vmem:[%s1097_s1 + $0x60] sm:$0xff]   ;;  %v826_v20 = vld [vmem:[%s1097_s1 + $0x68] sm:$0xff]  }
   0x6   :  { %717 = vmatprep.subr.bf16.mxu1 %v811_v5  ;;  %v819_v13 = vld [vmem:[%s1097_s1 + $0xd8] sm:$0xff]   ;;  %v823_v17 = vld [vmem:[%s1097_s1 + $0xe0] sm:$0xff]   ;;  %v827_v21 = vld [vmem:[%s1097_s1 + $0xe8] sm:$0xff]  }
   0x7   :  { %v820_v14 = vld [vmem:[%s1097_s1 + $0x18] sm:$0xff]   ;;  %v824_v18 = vld [vmem:[%s1097_s1 + $0x20] sm:$0xff]   ;;  %v828_v22 = vld [vmem:[%s1097_s1 + $0x28] sm:$0xff]  }
   0x8   :  { %684 = vmatpush3.bf16.msra.mxu0 %v812_v6  ;;  %v821_v15 = vld [vmem:[%s1097_s1 + $0x98] sm:$0xff]   ;;  %v825_v19 = vld [vmem:[%s1097_s1 + $0xa0] sm:$0xff]   ;;  %v829_v23 = vld [vmem:[%s1097_s1 + $0xa8] sm:$0xff]  }
   0x9   :  { %718 = vmatpush3.bf16.msra.mxu1 %v813_v7  ;;  %685 = vmatprep.subr.bf16.mxu0 %v814_v8  ;;  %v830_v24 = vld [vmem:[%s1097_s1 + $0x70] sm:$0xff]   ;;  %v834_v28 = vld [vmem:[%s1097_s1 + $0x78] sm:$0xff]   ;;  %v843_v36 = vld [vmem:[%s1098_s0 + $0xc] ss:$20 sps:$4 sm:$0xff]  }
   0xa   :  { %719 = vmatprep.subr.bf16.mxu1 %v815_v9  ;;  %v831_v25 = vld [vmem:[%s1097_s1 + $0xf0] sm:$0xff]   ;;  %v835_v29 = vld [vmem:[%s1097_s1 + $0xf8] sm:$0xff]   ;;  %v844_v37 = vld [vmem:[%s1097_s1 + $0x100] sm:$0xff]   ;;  %527 = vmatprep.mubr.bf16.mxu1 %v843_v36 }
   0xb   :  { %v832_v26 = vld [vmem:[%s1097_s1 + $0x30] sm:$0xff]   ;;  %v836_v30 = vld [vmem:[%s1097_s1 + $0x38] sm:$0xff]   ;;  %v845_v38 = vld [vmem:[%s1097_s1 + $0x108] sm:$0xff]  }
   0xc   :  { %686 = vmatpush3.bf16.msra.mxu0 %v816_v10  ;;  %v833_v27 = vld [vmem:[%s1097_s1 + $0xb0] sm:$0xff]   ;;  %v837_v31 = vld [vmem:[%s1097_s1 + $0xb8] sm:$0xff]   ;;  %v847_v39 = vld [vmem:[%s1098_s0 + $0x2c] ss:$20 sps:$4 sm:$0xff]  }
   0xd   :  { %720 = vmatpush3.bf16.msra.mxu1 %v817_v11  ;;  %687 = vmatprep.subr.bf16.mxu0 %v818_v12  ;;  %v838_v32 = vld [vmem:[%s1098_s0] ss:$20 sps:$4 sm:$0xff]   ;;  %v840_v33 = vld [vmem:[%s1098_s0 + $0x4] ss:$20 sps:$4 sm:$0xff]   ;;  %v841_v35 = vld [vmem:[%s1098_s0 + $0x8] ss:$20 sps:$4 sm:$0xff]  }
   0xe   :  { %721 = vmatprep.subr.bf16.mxu1 %v819_v13  ;;  %470 = vmatprep.mubr.bf16.mxu0 %v840_v33  ;;  %v846_v40 = vld [vmem:[%s1097_s1 + $0x110] sm:$0xff]   ;;  %v849_v42 = vld [vmem:[%s1098_s0 + $0x28] ss:$20 sps:$4 sm:$0xff]   ;;  %v854_v47 = vld [vmem:[%s1097_s1 + $0x120] sm:$0xff]  }
   0xf   :  { %v850_v41 = vld [vmem:[%s1098_s0 + $0x34] ss:$20 sps:$4 sm:$0xff]   ;;  %v852_v43 = vld [vmem:[%s1098_s0 + $0x30] ss:$20 sps:$4 sm:$0xff]   ;;  %v853_v46 = vld [vmem:[%s1097_s1 + $0x118] sm:$0xff]  }
  0x10   :  { %688 = vmatpush3.bf16.msra.mxu0 %v820_v14  ;;  %v855_v44 = vld [vmem:[%s1098_s0 + $0x54] ss:$20 sps:$4 sm:$0xff]   ;;  %v858_v45 = vld [vmem:[%s1098_s0 + $0x5c] ss:$20 sps:$4 sm:$0xff]   ;;  %v860_v49 = vld [vmem:[%s1098_s0 + $0x58] ss:$20 sps:$4 sm:$0xff]  }
  0x11   :  { %722 = vmatpush3.bf16.msra.mxu1 %v821_v15  ;;  %689 = vmatprep.subr.bf16.mxu0 %v822_v16  ;;  %v857_v48 = vld [vmem:[%s1098_s0 + $0x50] ss:$20 sps:$4 sm:$0xff]   ;;  %v861_v50 = vld [vmem:[%s1097_s1 + $0x128] sm:$0xff]   ;;  %v863_v52 = vld [vmem:[%s1097_s1 + $0x138] sm:$0xff]  }
  0x12   :  { %723 = vmatprep.subr.bf16.mxu1 %v823_v17  ;;  %v862_v51 = vld [vmem:[%s1097_s1 + $0x130] sm:$0xff]   ;;  %v865_v54 = vld [vmem:[%s1098_s0 + $0x38] ss:$20 sps:$4 sm:$0xff]   ;;  %v625_v58 = vld [vmem:[%s1099_s2] ss:$0 sm:$0xff] }
  0x13   :  { %v864_v53 = vld [vmem:[%s1098_s0 + $0x10] ss:$20 sps:$4 sm:$0xff]   ;;  %v866_v55 = vld [vmem:[%s1098_s0 + $0x60] ss:$20 sps:$4 sm:$0xff]  }
  0x14   :  { %690 = vmatpush3.bf16.msra.mxu0 %v824_v18 }
  0x15   :  { %724 = vmatpush3.bf16.msra.mxu1 %v825_v19  ;;  %691 = vmatprep.subr.bf16.mxu0 %v826_v20 }
  0x16   :  { %725 = vmatprep.subr.bf16.mxu1 %v827_v21 }
  0x18   :  { %692 = vmatpush3.bf16.msra.mxu0 %v828_v22 }
  0x19   :  { %726 = vmatpush3.bf16.msra.mxu1 %v829_v23  ;;  %693 = vmatprep.subr.bf16.mxu0 %v830_v24 }
  0x1a   :  { %727 = vmatprep.subr.bf16.mxu1 %v831_v25 }
  0x1c   :  { %694 = vmatpush3.bf16.msra.mxu0 %v832_v26 }
  0x1d   :  { %728 = vmatpush3.bf16.msra.mxu1 %v833_v27  ;;  %695 = vmatprep.subr.bf16.mxu0 %v834_v28 }
  0x1e   :  { %729 = vmatprep.subr.bf16.mxu1 %v835_v29 }
  0x20   :  { %696 = vmatpush3.bf16.msra.mxu0 %v836_v30 }
  0x21   :  { %730 = vmatpush3.bf16.msra.mxu1 %v837_v31  ;;  %760 = vmatprep.subr.bf16.mxu0 %v867_v34 }
  0x22   :  { %788 = vmatprep.subr.bf16.mxu1 %v867_v34 }
  0x23   :  { %471 = vmatmul.mubr.bf16.vlgmr.msra.gmra.mrb[0].mxu0 %v838_v32 }
  0x24   :  { %528 = vmatmul.mubr.bf16.vlgmr.msra.gmra.mrb[0].mxu1 %v841_v35  ;;  %761 = vmatpush3.bf16.msra.mxu0 %v844_v37 }
  0x25   :  { %796 = vmatpush3.bf16.msra.mxu1 %v844_v37  ;;  %762 = vmatprep.subr.bf16.mxu0 %v867_v34 }
  0x26   :  { %789 = vmatprep.subr.bf16.mxu1 %v867_v34  ;;  %478 = vmatprep.mubr.bf16.mxu0 %v847_v39 }
  0x27   :  { %535 = vmatprep.mubr.bf16.mxu1 %v850_v41 }
  0x28   :  { %763 = vmatpush3.bf16.msra.mxu0 %v845_v38 }
  0x29   :  { %797 = vmatpush3.bf16.msra.mxu1 %v845_v38  ;;  %764 = vmatprep.subr.bf16.mxu0 %v867_v34 }
  0x2a   :  { %790 = vmatprep.subr.bf16.mxu1 %v867_v34 }
  0x2b   :  { %479 = vmatmul.mubr.bf16.gmra.mrb[4].mxu0 %v849_v42 }
  0x2c   :  { %765 = vmatpush3.bf16.msra.mxu0 %v846_v40  ;;  %536 = vmatmul.mubr.bf16.gmra.mrb[4].mxu1 %v852_v43 }
  0x2d   :  { %798 = vmatpush3.bf16.msra.mxu1 %v846_v40  ;;  %766 = vmatprep.subr.bf16.mxu0 %v867_v34 }
  0x2e   :  { %791 = vmatprep.subr.bf16.mxu1 %v867_v34  ;;  %486 = vmatprep.mubr.bf16.mxu0 %v855_v44 }
  0x2f   :  { %543 = vmatprep.mubr.bf16.mxu1 %v858_v45 }
  0x30   :  { %767 = vmatpush3.bf16.msra.mxu0 %v853_v46 }
  0x31   :  { %799 = vmatpush3.bf16.msra.mxu1 %v853_v46  ;;  %768 = vmatprep.subr.bf16.mxu0 %v867_v34 }
  0x32   :  { %792 = vmatprep.subr.bf16.mxu1 %v867_v34 }
  0x33   :  { %487 = vmatmul.mubr.bf16.gmra.mrb[8].mxu0 %v857_v48 }
  0x34   :  { %769 = vmatpush3.bf16.msra.mxu0 %v854_v47  ;;  %544 = vmatmul.mubr.bf16.gmra.mrb[8].mxu1 %v860_v49 }
  0x35   :  { %800 = vmatpush3.bf16.msra.mxu1 %v854_v47  ;;  %770 = vmatprep.subr.bf16.mxu0 %v867_v34 }
  0x36   :  { %793 = vmatprep.subr.bf16.mxu1 %v867_v34  ;;  %776 = vmatprep.mubr.msk.bf16.mxu0 %vm868_vm0, %v867_v34 }
  0x37   :  { %780 = vmatprep.mubr.msk.bf16.mxu1 %vm868_vm0, %v867_v34 }
  0x38   :  { %771 = vmatpush3.bf16.msra.mxu0 %v861_v50 }
  0x39   :  { %801 = vmatpush3.bf16.msra.mxu1 %v861_v50  ;;  %772 = vmatprep.subr.bf16.mxu0 %v867_v34 }
  0x3a   :  { %794 = vmatprep.subr.bf16.mxu1 %v867_v34 }
  0x3c   :  { %773 = vmatpush3.bf16.msra.mxu0 %v862_v51 }
  0x3d   :  { %802 = vmatpush3.bf16.msra.mxu1 %v862_v51  ;;  %774 = vmatprep.subr.bf16.mxu0 %v867_v34 }
  0x3e   :  { %795 = vmatprep.subr.bf16.mxu1 %v867_v34 }
  0x40   :  { %775 = vmatpush3.bf16.msra.mxu0 %v863_v52 }
  0x41   :  { %803 = vmatpush3.bf16.msra.mxu1 %v863_v52 }
  0x43   :  { %777 = vmatmul.mubr.bf16.vlgmr.msra.gmra.mrb[12].mxu0 %v864_v53 }
  0x44   :  { %781 = vmatmul.mubr.bf16.vlgmr.msra.gmra.mrb[12].mxu1 %v865_v54 }
  0x45   :  { %784 = vmatprep.mubr.msk.bf16.mxu1 %vm868_vm0, %v867_v34 }
  0x4c   :  { %785 = vmatmul.mubr.bf16.gmra.mrb[16].mxu1 %v866_v55 }
  0xf6   :  { %v697_v56 = vpop.f32.mrb[0].mxu0 }
  0xf7   :  { %v731_v57 = vpop.f32.mrb[0].mxu1  ;;  %v698_v59 = vpop.f32.mrb[1].mxu0 }
  0xf8   :  { %v699_v60 = vadd.f32 %v698_v59, %v697_v56  ;;  %v732_v61 = vpop.f32.mrb[1].mxu1  ;;  %v700_v62 = vpop.f32.mrb[2].mxu0 }
  0xf9   :  { %v733_v63 = vadd.f32 %v732_v61, %v731_v57  ;;  %v734_v0 = vpop.f32.mrb[2].mxu1  ;;  %v701_v1 = vpop.f32.mrb[3].mxu0 }
  0xfa   :  { %v473_v2 = vadd.f32 %v699_v60, %v625_v58  ;;  %v702_v3 = vadd.f32 %v701_v1, %v700_v62  ;;  %v735_v4 = vpop.f32.mrb[3].mxu1 }
  0xfb   :  { %v736_v5 = vadd.f32 %v735_v4, %v734_v0 }
  0xfc   :  { %v476_v6 = vadd.f32 %v702_v3, %v625_v58  ;;  %v530_v7 = vadd.f32 %v733_v63, %v473_v2 }
  0xfe   :  { %v703_v8 = vpop.f32.mrb[4].mxu0  ;;  %v533_v9 = vadd.f32 %v736_v5, %v476_v6 }
  0xff   :  { %v704_v10 = vpop.f32.mrb[5].mxu0  ;;  %v737_v11 = vpop.f32.mrb[4].mxu1 }
 0x100   :  { %v705_v12 = vadd.f32 %v704_v10, %v703_v8  ;;  %v706_v13 = vpop.f32.mrb[6].mxu0  ;;  %v738_v14 = vpop.f32.mrb[5].mxu1 }
 0x101   :  { %v707_v15 = vpop.f32.mrb[7].mxu0  ;;  %v739_v16 = vadd.f32 %v738_v14, %v737_v11  ;;  %v740_v17 = vpop.f32.mrb[6].mxu1 }
 0x102   :  { %v481_v18 = vadd.f32 %v705_v12, %v625_v58  ;;  %v708_v19 = vadd.f32 %v707_v15, %v706_v13  ;;  %v741_v20 = vpop.f32.mrb[7].mxu1 }
 0x103   :  { %v742_v21 = vadd.f32 %v741_v20, %v740_v17 }
 0x104   :  { %v484_v22 = vadd.f32 %v708_v19, %v625_v58  ;;  %v538_v23 = vadd.f32 %v739_v16, %v481_v18 }
 0x106   :  { %v709_v24 = vpop.f32.mrb[8].mxu0  ;;  %v541_v25 = vadd.f32 %v742_v21, %v484_v22 }
 0x107   :  { %v710_v26 = vpop.f32.mrb[9].mxu0  ;;  %v743_v27 = vpop.f32.mrb[8].mxu1 }
 0x108   :  { %v711_v28 = vadd.f32 %v710_v26, %v709_v24  ;;  %v712_v29 = vpop.f32.mrb[10].mxu0  ;;  %v744_v30 = vpop.f32.mrb[9].mxu1 }
 0x109   :  { %v713_v31 = vpop.f32.mrb[11].mxu0  ;;  %v745_v32 = vadd.f32 %v744_v30, %v743_v27  ;;  %v746_v33 = vpop.f32.mrb[10].mxu1 }
 0x10a   :  { %v489_v34 = vadd.f32 %v711_v28, %v625_v58  ;;  %v714_v35 = vadd.f32 %v713_v31, %v712_v29  ;;  %v747_v36 = vpop.f32.mrb[11].mxu1 }
 0x10b   :  { %v748_v37 = vadd.f32 %v747_v36, %v746_v33 }
 0x10c   :  { %v492_v38 = vadd.f32 %v714_v35, %v625_v58  ;;  %v546_v39 = vadd.f32 %v745_v32, %v489_v34 }
 0x10e   :  { %v549_v40 = vadd.f32 %v748_v37, %v492_v38 }
 0x116   :  { %v586_v41 = vpop.f32.mrb[12].mxu0 }
 0x117   :  { %v587_v42 = vadd.f32 %v586_v41, %v530_v7  ;;  %v594_v43 = vpop.f32.mrb[12].mxu1  ;;  %v778_v44 = vpop.f32.mrb[13].mxu0 }
 0x118   :  { %v595_v45 = vadd.f32 %v594_v43, %v538_v23  ;;  %v782_v46 = vpop.f32.mrb[13].mxu1  ;;  %v589_v47 = vpop.f32.mrb[14].mxu0 }
 0x119   :  { %v609_v48 = vmax.f32 %v587_v42, 0.0  ;;  %v590_v49 = vadd.f32 %v589_v47, %v533_v9  ;;  %v597_v50 = vpop.f32.mrb[14].mxu1  ;;  %v779_v51 = vpop.f32.mrb[15].mxu0 }
 0x11a   :  { %v611_v52 = vmax.f32 %v595_v45, 0.0  ;;  %v598_v53 = vadd.f32 %v597_v50, %v541_v25  ;;  %v783_v54 = vpop.f32.mrb[15].mxu1 }
 0x11b   :  { %615 = vst [vmem:[%s1100_s3] sm:$0xff] %v609_v48  ;;  %v610_v55 = vmax.f32 %v590_v49, 0.0 }
 0x11c   :  { %617 = vst [vmem:[%s1100_s3 + $0x10] sm:$0xff] %v611_v52  ;;  %v612_v56 = vmax.f32 %v598_v53, 0.0 }
 0x11d   :  { %616 = vst [vmem:[%s1100_s3 + $0x8] sm:$0xff] %v610_v55 }
 0x11e   :  { %618 = vst [vmem:[%s1100_s3 + $0x18] sm:$0xff] %v612_v56 }
 0x11f   :  { %v602_v57 = vpop.f32.mrb[16].mxu1 }
 0x120   :  { %v603_v58 = vadd.f32 %v602_v57, %v546_v39  ;;  %v786_v59 = vpop.f32.mrb[17].mxu1 }
 0x121   :  { %v605_v60 = vpop.f32.mrb[18].mxu1 }
 0x122   :  { %v613_v61 = vmax.f32 %v603_v58, 0.0  ;;  %v606_v62 = vadd.f32 %v605_v60, %v549_v40  ;;  %v787_v63 = vpop.f32.mrb[19].mxu1 }
 0x124   :  { %619 = vst [vmem:[%s1100_s3 + $0x20] sm:$0xff] %v613_v61  ;;  %v614_v0 = vmax.f32 %v606_v62, 0.0 }
 0x126   :  { %620 = vst [vmem:[%s1100_s3 + $0x28] sm:$0xff] %v614_v0 }

// kernel: forward.13
= control target key start
LH: loop header
LB: loop body
LE: loop exit
PB: predicated region body
PF: predicated region fallthrough
CT: control target
= control target key end

     0   :  { %v401_v1 = vmov 0   ;;  %v50_v34 = vlaneseq  ;;  %s536_s1 = inlined_call_operand.vmem [shape: bf16[128,512], index: 1, kind: input, shape index: {}]   ;;  %s537_s0 = inlined_call_operand.vmem [shape: bf16[8,128], index: 0, kind: input, shape index: {}]   ;;  %s538_s2 = inlined_call_operand.vmem [shape: f32[1,512], index: 2, kind: input, shape index: {}]   ;;  %s539_s3 = inlined_call_operand.vmem [shape: f32[8,512], index: 3, kind: output, shape index: {}]  }
   0x1   :  { %v353_v0 = vld [vmem:[%s536_s1 + $0x4] ss:$16 sps:$4 sm:$0xff]   ;;  %262 = vmatprep.mubr.bf16.mxu0 %v401_v1  ;;  %303 = vmatprep.mubr.bf16.mxu1 %v401_v1  ;;  %v355_v2 = vld [vmem:[%s536_s1 + $0xc] ss:$16 sps:$4 sm:$0xff]   ;;  %v357_v3 = vld [vmem:[%s536_s1] ss:$16 sps:$4 sm:$0xff]  }
   0x2   :  { %230 = vmatprep.subr.bf16.mxu0 %v353_v0  ;;  %v358_v4 = vld [vmem:[%s536_s1 + $0x8] ss:$16 sps:$4 sm:$0xff]   ;;  %271 = vmatprep.subr.bf16.mxu1 %v355_v2  ;;  %v359_v5 = vld [vmem:[%s536_s1 + $0x24] ss:$16 sps:$4 sm:$0xff]   ;;  %v361_v6 = vld [vmem:[%s536_s1 + $0x2c] ss:$16 sps:$4 sm:$0xff]  }
   0x3   :  { %231 = vmatpush1.bf16.msra.mxu0 %v357_v3  ;;  %272 = vmatpush1.bf16.msra.mxu1 %v358_v4  ;;  %v363_v7 = vld [vmem:[%s536_s1 + $0x20] ss:$16 sps:$4 sm:$0xff]   ;;  %v364_v8 = vld [vmem:[%s536_s1 + $0x28] ss:$16 sps:$4 sm:$0xff]   ;;  %v365_v9 = vld [vmem:[%s536_s1 + $0x44] ss:$16 sps:$4 sm:$0xff]  }
   0x4   :  { %232 = vmatprep.subr.bf16.mxu0 %v359_v5  ;;  %273 = vmatprep.subr.bf16.mxu1 %v361_v6  ;;  %v367_v10 = vld [vmem:[%s536_s1 + $0x4c] ss:$16 sps:$4 sm:$0xff]   ;;  %v369_v11 = vld [vmem:[%s536_s1 + $0x40] ss:$16 sps:$4 sm:$0xff]   ;;  %v370_v12 = vld [vmem:[%s536_s1 + $0x48] ss:$16 sps:$4 sm:$0xff]  }
   0x5   :  { %v371_v13 = vld [vmem:[%s536_s1 + $0x64] ss:$16 sps:$4 sm:$0xff]   ;;  %v373_v14 = vld [vmem:[%s536_s1 + $0x6c] ss:$16 sps:$4 sm:$0xff]   ;;  %v375_v15 = vld [vmem:[%s536_s1 + $0x60] ss:$16 sps:$4 sm:$0xff]  }
   0x6   :  { %v376_v16 = vld [vmem:[%s536_s1 + $0x68] ss:$16 sps:$4 sm:$0xff]   ;;  %v377_v17 = vld [vmem:[%s536_s1 + $0x84] ss:$16 sps:$4 sm:$0xff]   ;;  %v379_v18 = vld [vmem:[%s536_s1 + $0x8c] ss:$16 sps:$4 sm:$0xff]  }
   0x7   :  { %233 = vmatpush1.bf16.msra.mxu0 %v363_v7  ;;  %274 = vmatpush1.bf16.msra.mxu1 %v364_v8  ;;  %v381_v19 = vld [vmem:[%s536_s1 + $0x80] ss:$16 sps:$4 sm:$0xff]   ;;  %v382_v20 = vld [vmem:[%s536_s1 + $0x88] ss:$16 sps:$4 sm:$0xff]   ;;  %v383_v21 = vld [vmem:[%s536_s1 + $0xa4] ss:$16 sps:$4 sm:$0xff]  }
   0x8   :  { %234 = vmatprep.subr.bf16.mxu0 %v365_v9  ;;  %275 = vmatprep.subr.bf16.mxu1 %v367_v10  ;;  %v385_v22 = vld [vmem:[%s536_s1 + $0xac] ss:$16 sps:$4 sm:$0xff]   ;;  %v387_v23 = vld [vmem:[%s536_s1 + $0xa0] ss:$16 sps:$4 sm:$0xff]   ;;  %v388_v24 = vld [vmem:[%s536_s1 + $0xa8] ss:$16 sps:$4 sm:$0xff]  }
   0x9   :  { %v389_v25 = vld [vmem:[%s536_s1 + $0xc4] ss:$16 sps:$4 sm:$0xff]   ;;  %v391_v26 = vld [vmem:[%s536_s1 + $0xcc] ss:$16 sps:$4 sm:$0xff]   ;;  %v393_v27 = vld [vmem:[%s536_s1 + $0xc0] ss:$16 sps:$4 sm:$0xff]  }
   0xa   :  { %v394_v28 = vld [vmem:[%s536_s1 + $0xc8] ss:$16 sps:$4 sm:$0xff]   ;;  %v395_v29 = vld [vmem:[%s536_s1 + $0xe4] ss:$16 sps:$4 sm:$0xff]   ;;  %v397_v30 = vld [vmem:[%s536_s1 + $0xec] ss:$16 sps:$4 sm:$0xff]  }
   0xb   :  { %235 = vmatpush1.bf16.msra.mxu0 %v369_v11  ;;  %276 = vmatpush1.bf16.msra.mxu1 %v370_v12  ;;  %v399_v31 = vld [vmem:[%s536_s1 + $0xe0] ss:$16 sps:$4 sm:$0xff]   ;;  %v400_v32 = vld [vmem:[%s536_s1 + $0xe8] ss:$16 sps:$4 sm:$0xff]   ;;  %v51_v35 = vshrl.u32 %v50_v34, 7 }
   0xc   :  { %236 = vmatprep.subr.bf16.mxu0 %v371_v13  ;;  %277 = vmatprep.subr.bf16.mxu1 %v373_v14  ;;  %v15_v33 = vld [vmem:[%s537_s0] sm:$0xf] }
   0xd   :  { %v52_v36 = vsub.s32 0, %v51_v35  ;;  %v60_v37 = vsub.s32 2, %v51_v35  ;;  %v48_v38 = vld [vmem:[%s538_s2] sm:$0xf]  ;;  %v56_v39 = vsub.s32 1, %v51_v35  ;;  %v64_v40 = vsub.s32 3, %v51_v35 }
   0xf   :  { %237 = vmatpush1.bf16.msra.mxu0 %v375_v15  ;;  %278 = vmatpush1.bf16.msra.mxu1 %v376_v16  ;;  %v53_v41 = vrot.slane %v48_v38, %v52_v36  ;;  %v61_v42 = vrot.slane %v48_v38, %v60_v37  ;;  %v57_v43 = vrot.slane %v48_v38, %v56_v39 }
  0x10   :  { %238 = vmatprep.subr.bf16.mxu0 %v377_v17  ;;  %279 = vmatprep.subr.bf16.mxu1 %v379_v18  ;;  %v65_v44 = vrot.slane %v48_v38, %v64_v40 }
  0x13   :  { %239 = vmatpush1.bf16.msra.mxu0 %v381_v19  ;;  %280 = vmatpush1.bf16.msra.mxu1 %v382_v20 }
  0x14   :  { %240 = vmatprep.subr.bf16.mxu0 %v383_v21  ;;  %281 = vmatprep.subr.bf16.mxu1 %v385_v22 }
  0x17   :  { %241 = vmatpush1.bf16.msra.mxu0 %v387_v23  ;;  %282 = vmatpush1.bf16.msra.mxu1 %v388_v24 }
  0x18   :  { %242 = vmatprep.subr.bf16.mxu0 %v389_v25  ;;  %283 = vmatprep.subr.bf16.mxu1 %v391_v26 }
  0x1b   :  { %243 = vmatpush1.bf16.msra.mxu0 %v393_v27  ;;  %284 = vmatpush1.bf16.msra.mxu1 %v394_v28 }
  0x1c   :  { %244 = vmatprep.subr.bf16.mxu0 %v395_v29  ;;  %285 = vmatprep.subr.bf16.mxu1 %v397_v30 }
  0x1f   :  { %245 = vmatpush1.bf16.msra.mxu0 %v399_v31  ;;  %286 = vmatpush1.bf16.msra.mxu1 %v400_v32 }
  0x22   :  { %263 = vmatmul.mubr.bf16.vlgmr.msra.gmra.mrb[0].mxu0 %v15_v33  ;;  %304 = vmatmul.mubr.bf16.vlgmr.msra.gmra.mrb[0].mxu1 %v15_v33 }
  0xf5   :  { %v264_v45 = vpop.f32.mrb[0].mxu0  ;;  %v305_v46 = vpop.f32.mrb[0].mxu1 }
  0xf6   :  { %v265_v47 = vadd.f32 %v264_v45, %v53_v41  ;;  %v306_v48 = vadd.f32 %v305_v46, %v61_v42  ;;  %v266_v49 = vpop.f32.mrb[1].mxu0  ;;  %v307_v50 = vpop.f32.mrb[1].mxu1 }
  0xf7   :  { %v267_v51 = vadd.f32 %v266_v49, %v57_v43  ;;  %v308_v52 = vadd.f32 %v307_v50, %v65_v44  ;;  %v268_v53 = vpop.f32.mrb[2].mxu0  ;;  %v309_v54 = vpop.f32.mrb[2].mxu1 }
  0xf8   :  { %312 = vst [vmem:[%s539_s3] sm:$0xff] %v265_v47  ;;  %314 = vst [vmem:[%s539_s3 + $0x10] sm:$0xff] %v306_v48  ;;  %v269_v55 = vpop.f32.mrb[3].mxu0  ;;  %v310_v56 = vpop.f32.mrb[3].mxu1 }
  0xf9   :  { %313 = vst [vmem:[%s539_s3 + $0x8] sm:$0xff] %v267_v51  ;;  %315 = vst [vmem:[%s539_s3 + $0x18] sm:$0xff] %v308_v52 }

// kernel: forward.15
= control target key start
LH: loop header
LB: loop body
LE: loop exit
PB: predicated region body
PF: predicated region fallthrough
CT: control target
= control target key end

     0   :  { %v180_v0 = vmov 0.0   ;;  %vm181_vm0 = vmmov 0   ;;  %s235_s1 = inlined_call_operand.vmem [shape: bf16[128,128], index: 1, kind: input, shape index: {}]   ;;  %s236_s0 = inlined_call_operand.vmem [shape: bf16[8,128], index: 0, kind: input, shape index: {}]   ;;  %s237_s2 = inlined_call_operand.vmem [shape: f32[1,128], index: 2, kind: input, shape index: {}]   ;;  %s238_s3 = inlined_call_operand.vmem [shape: f32[8,128], index: 3, kind: output, shape index: {}]  }
   0x1   :  { %150 = vmatprep.subr.bf16.mxu0 %v180_v0  ;;  %v172_v1 = vld [vmem:[%s235_s1] sm:$0xff]   ;;  %166 = vmatprep.mubr.msk.bf16.mxu0 %vm181_vm0, %v180_v0  ;;  %v173_v2 = vld [vmem:[%s235_s1 + $0x8] sm:$0xff]   ;;  %v174_v3 = vld [vmem:[%s235_s1 + $0x10] sm:$0xff]  }
   0x2   :  { %151 = vmatpush3.bf16.msra.mxu0 %v172_v1  ;;  %v175_v4 = vld [vmem:[%s235_s1 + $0x18] sm:$0xff]   ;;  %v176_v5 = vld [vmem:[%s235_s1 + $0x20] sm:$0xff]   ;;  %v177_v6 = vld [vmem:[%s235_s1 + $0x28] sm:$0xff]  }
   0x3   :  { %152 = vmatprep.subr.bf16.mxu0 %v180_v0  ;;  %v178_v7 = vld [vmem:[%s235_s1 + $0x30] sm:$0xff]   ;;  %v179_v8 = vld [vmem:[%s235_s1 + $0x38] sm:$0xff]   ;;  %v15_v9 = vld [vmem:[%s236_s0] sm:$0xf] }
   0x4   :  { %v132_v10 = vld [vmem:[%s237_s2] ss:$0 sm:$0xff] }
   0x6   :  { %153 = vmatpush3.bf16.msra.mxu0 %v173_v2 }
   0x7   :  { %154 = vmatprep.subr.bf16.mxu0 %v180_v0 }
   0xa   :  { %155 = vmatpush3.bf16.msra.mxu0 %v174_v3 }
   0xb   :  { %156 = vmatprep.subr.bf16.mxu0 %v180_v0 }
   0xe   :  { %157 = vmatpush3.bf16.msra.mxu0 %v175_v4 }
   0xf   :  { %158 = vmatprep.subr.bf16.mxu0 %v180_v0 }
  0x12   :  { %159 = vmatpush3.bf16.msra.mxu0 %v176_v5 }
  0x13   :  { %160 = vmatprep.subr.bf16.mxu0 %v180_v0 }
  0x16   :  { %161 = vmatpush3.bf16.msra.mxu0 %v177_v6 }
  0x17   :  { %162 = vmatprep.subr.bf16.mxu0 %v180_v0 }
  0x1a   :  { %163 = vmatpush3.bf16.msra.mxu0 %v178_v7 }
  0x1b   :  { %164 = vmatprep.subr.bf16.mxu0 %v180_v0 }
  0x1e   :  { %165 = vmatpush3.bf16.msra.mxu0 %v179_v8 }
  0x21   :  { %167 = vmatmul.mubr.bf16.vlgmr.msra.gmra.mrb[0].mxu0 %v15_v9 }
  0xf4   :  { %v121_v11 = vpop.f32.mrb[0].mxu0 }
  0xf5   :  { %v122_v12 = vadd.f32 %v132_v10, %v121_v11  ;;  %v168_v13 = vpop.f32.mrb[1].mxu0 }
  0xf6   :  { %v124_v14 = vpop.f32.mrb[2].mxu0 }
  0xf7   :  { %127 = vst [vmem:[%s238_s3] sm:$0xff] %v122_v12  ;;  %v169_v15 = vpop.f32.mrb[3].mxu0 }

// kernel: forward.14
= control target key start
LH: loop header
LB: loop body
LE: loop exit
PB: predicated region body
PF: predicated region fallthrough
CT: control target
= control target key end

     0   :  { %s650_s9 = smov 0   ;;  %s772_s0 = inlined_call_operand.vmem [shape: f32[2,2,512], index: 0, kind: input, shape index: {}]   ;;  %s773_s1 = inlined_call_operand.vmem [shape: bf16[128,512], index: 1, kind: input, shape index: {}]   ;;  %s774_s2 = inlined_call_operand.vmem [shape: f32[2,128], index: 2, kind: output, shape index: {}]  }
   0x1 LB: > { %s656_s10 = sadd.s32 4294967295, %s630_s9   ;;  %p506_p0 = scmp.ge.s32.totalorder %s630_s9, 1  ;;  %s630_s9 = sphi %s650_s9, %s12_s9  }
   0x2   : > { %p107_p1 = scmp.lt.s32.totalorder %s630_s9, 3 }
   0x4   : > { %p108_p2 = pnand %p506_p0, %p107_p1 }
   0x5   : > { %p124_p3 = scmp.lt.s32.totalorder (!%p108_p2), %s656_s10, 1  ;;  %p509_p4 = scmp.ne.s32.totalorder (!%p108_p2), %s656_s10, 0 }
   0x6   : > { %111 = sbr.rel (%p108_p2) target bundleno = 322 (0x142), region = 28 }
   0xd   : > { %s125_s11 = scalar_select %p124_p3, %s656_s10, 1 }
   0xe   : > { %133 = sbr.rel (%p509_p4) target bundleno = 21 (0x15), region = 32  ;;  %v632_v0 = vmov (!%p509_p4), 0.0  }
   0xf   : > { %s548_s12 = sshll.u32 %s125_s11, 3  ;;  %134 = vst [vmem:[#allocation2] sm:$0x3] (!%p509_p4), %v632_v0  ;;  %135 = vst [vmem:[#allocation3] sm:$0x3] (!%p509_p4), %v632_v0 }
  0x10   : > { %s665_s15 = scalar_lea.vmem %s772_s0, %s548_s12 }
  0x15 PF: > { %v560_v1 = vld [vmem:[%s773_s1 + $0x4] ss:$16 sps:$4 sm:$0xff]   ;;  %v562_v2 = vld [vmem:[%s773_s1 + $0xc] ss:$16 sps:$4 sm:$0xff]   ;;  %v633_v3 = vmov 0   ;;  %v422_v38 = vlaneseq  ;;  %p545_p5 = scmp.ne.s32.totalorder %s656_s10, 1 }
  0x16   : > { %363 = vmatprep.mubr.bf16.mxu0 %v633_v3  ;;  %404 = vmatprep.mubr.bf16.mxu1 %v633_v3  ;;  %v564_v4 = vld [vmem:[%s773_s1] ss:$16 sps:$4 sm:$0xff]   ;;  %v565_v5 = vld [vmem:[%s773_s1 + $0x8] ss:$16 sps:$4 sm:$0xff]   ;;  %v566_v6 = vld [vmem:[%s773_s1 + $0x24] ss:$16 sps:$4 sm:$0xff]  }
  0x17   : > { %331 = vmatprep.subr.bf16.mxu0 %v560_v1  ;;  %372 = vmatprep.subr.bf16.mxu1 %v562_v2  ;;  %v568_v7 = vld [vmem:[%s773_s1 + $0x2c] ss:$16 sps:$4 sm:$0xff]   ;;  %v570_v8 = vld [vmem:[%s773_s1 + $0x20] ss:$16 sps:$4 sm:$0xff]   ;;  %v571_v9 = vld [vmem:[%s773_s1 + $0x28] ss:$16 sps:$4 sm:$0xff]  }
  0x18   : > { %332 = vmatpush1.bf16.msra.mxu0 %v564_v4  ;;  %373 = vmatpush1.bf16.msra.mxu1 %v565_v5  ;;  %v572_v10 = vld [vmem:[%s773_s1 + $0x44] ss:$16 sps:$4 sm:$0xff]   ;;  %v574_v11 = vld [vmem:[%s773_s1 + $0x4c] ss:$16 sps:$4 sm:$0xff]   ;;  %v576_v12 = vld [vmem:[%s773_s1 + $0x40] ss:$16 sps:$4 sm:$0xff]  }
  0x19   : > { %333 = vmatprep.subr.bf16.mxu0 %v566_v6  ;;  %374 = vmatprep.subr.bf16.mxu1 %v568_v7  ;;  %v577_v13 = vld [vmem:[%s773_s1 + $0x48] ss:$16 sps:$4 sm:$0xff]   ;;  %v578_v14 = vld [vmem:[%s773_s1 + $0x64] ss:$16 sps:$4 sm:$0xff]   ;;  %v580_v15 = vld [vmem:[%s773_s1 + $0x6c] ss:$16 sps:$4 sm:$0xff]  }
  0x1a   : > { %v582_v16 = vld [vmem:[%s773_s1 + $0x60] ss:$16 sps:$4 sm:$0xff]   ;;  %v583_v17 = vld [vmem:[%s773_s1 + $0x68] ss:$16 sps:$4 sm:$0xff]   ;;  %v584_v18 = vld [vmem:[%s773_s1 + $0x84] ss:$16 sps:$4 sm:$0xff]  }
  0x1b   : > { %v586_v19 = vld [vmem:[%s773_s1 + $0x8c] ss:$16 sps:$4 sm:$0xff]   ;;  %v588_v20 = vld [vmem:[%s773_s1 + $0x80] ss:$16 sps:$4 sm:$0xff]   ;;  %v589_v21 = vld [vmem:[%s773_s1 + $0x88] ss:$16 sps:$4 sm:$0xff]  }
  0x1c   : > { %334 = vmatpush1.bf16.msra.mxu0 %v570_v8  ;;  %375 = vmatpush1.bf16.msra.mxu1 %v571_v9  ;;  %v590_v22 = vld [vmem:[%s773_s1 + $0xa4] ss:$16 sps:$4 sm:$0xff]   ;;  %v592_v23 = vld [vmem:[%s773_s1 + $0xac] ss:$16 sps:$4 sm:$0xff]   ;;  %v594_v24 = vld [vmem:[%s773_s1 + $0xa0] ss:$16 sps:$4 sm:$0xff]  }
  0x1d   : > { %335 = vmatprep.subr.bf16.mxu0 %v572_v10  ;;  %376 = vmatprep.subr.bf16.mxu1 %v574_v11  ;;  %v595_v25 = vld [vmem:[%s773_s1 + $0xa8] ss:$16 sps:$4 sm:$0xff]   ;;  %v596_v26 = vld [vmem:[%s773_s1 + $0xc4] ss:$16 sps:$4 sm:$0xff]   ;;  %v598_v27 = vld [vmem:[%s773_s1 + $0xcc] ss:$16 sps:$4 sm:$0xff]  }
  0x1e   : > { %v600_v28 = vld [vmem:[%s773_s1 + $0xc0] ss:$16 sps:$4 sm:$0xff]   ;;  %v601_v29 = vld [vmem:[%s773_s1 + $0xc8] ss:$16 sps:$4 sm:$0xff]   ;;  %v602_v30 = vld [vmem:[%s773_s1 + $0xe4] ss:$16 sps:$4 sm:$0xff]  }
  0x1f   : > { %v604_v31 = vld [vmem:[%s773_s1 + $0xec] ss:$16 sps:$4 sm:$0xff]   ;;  %v606_v32 = vld [vmem:[%s773_s1 + $0xe0] ss:$16 sps:$4 sm:$0xff]   ;;  %v607_v33 = vld [vmem:[%s773_s1 + $0xe8] ss:$16 sps:$4 sm:$0xff]  }
  0x20   : > { %336 = vmatpush1.bf16.msra.mxu0 %v576_v12  ;;  %377 = vmatpush1.bf16.msra.mxu1 %v577_v13  ;;  %v137_v34 = vld [vmem:[#allocation2] sm:$0x3]  ;;  %v634_v36 = vmov 1983009808   ;;  %v423_v40 = vshrl.u32 %v422_v38, 7 }
  0x21   : > { %337 = vmatprep.subr.bf16.mxu0 %v578_v14  ;;  %378 = vmatprep.subr.bf16.mxu1 %v580_v15  ;;  %v138_v35 = vpack.c.bf16 %v137_v34, %v137_v34  ;;  %v420_v37 = vunpack.c.l.s4 %v634_v36  ;;  %v136_v54 = vld [vmem:[%s665_s15] sm:$0xff] }
  0x22   : > { %v462_v5 = vld [vmem:[#allocation3] sm:$0x3] }
  0x23   : > { %v421_v39 = vunpack.c.0.s8 %v420_v37 }
  0x24   : > { %338 = vmatpush1.bf16.msra.mxu0 %v582_v16  ;;  %379 = vmatpush1.bf16.msra.mxu1 %v583_v17 }
  0x25   : > { %339 = vmatprep.subr.bf16.mxu0 %v584_v18  ;;  %380 = vmatprep.subr.bf16.mxu1 %v586_v19  ;;  %v424_v43 = vsub.s32 %v421_v39, %v423_v40 }
  0x28   : > { %340 = vmatpush1.bf16.msra.mxu0 %v588_v20  ;;  %381 = vmatpush1.bf16.msra.mxu1 %v589_v21 }
  0x29   : > { %341 = vmatprep.subr.bf16.mxu0 %v590_v22  ;;  %382 = vmatprep.subr.bf16.mxu1 %v592_v23 }
  0x2c   : > { %342 = vmatpush1.bf16.msra.mxu0 %v594_v24  ;;  %383 = vmatpush1.bf16.msra.mxu1 %v595_v25 }
  0x2d   : > { %343 = vmatprep.subr.bf16.mxu0 %v596_v26  ;;  %384 = vmatprep.subr.bf16.mxu1 %v598_v27 }
  0x30   : > { %344 = vmatpush1.bf16.msra.mxu0 %v600_v28  ;;  %385 = vmatpush1.bf16.msra.mxu1 %v601_v29 }
  0x31   : > { %345 = vmatprep.subr.bf16.mxu0 %v602_v30  ;;  %386 = vmatprep.subr.bf16.mxu1 %v604_v31 }
  0x34   : > { %346 = vmatpush1.bf16.msra.mxu0 %v606_v32  ;;  %387 = vmatpush1.bf16.msra.mxu1 %v607_v33 }
  0x37   : > { %364 = vmatmul.mubr.bf16.vlgmr.msra.gmra.mrb[0].mxu0 %v138_v35  ;;  %405 = vmatmul.mubr.bf16.vlgmr.msra.gmra.mrb[0].mxu1 %v138_v35 }
 0x10a   : > { %v365_v41 = vpop.f32.mrb[0].mxu0  ;;  %v406_v42 = vpop.f32.mrb[0].mxu1 }
 0x10b   : > { %v367_v44 = vpop.f32.mrb[1].mxu0  ;;  %v408_v45 = vpop.f32.mrb[1].mxu1 }
 0x10c   : > { %v417_v46 = vcombine.low %v365_v41, %v367_v44  ;;  %v418_v47 = vcombine.low %v406_v42, %v408_v45  ;;  %v369_v48 = vpop.f32.mrb[2].mxu0  ;;  %v410_v49 = vpop.f32.mrb[2].mxu1 }
 0x10d   : > { %v370_v50 = vpop.f32.mrb[3].mxu0  ;;  %v411_v51 = vpop.f32.mrb[3].mxu1 }
 0x10e   : > { %v425_v52 = vrot.slane %v417_v46, %v424_v43  ;;  %v432_v53 = vrot.slane %v418_v47, %v424_v43 }
 0x110   : > { %v433_v55 = vcombine.low %v425_v52, %v432_v53 }
 0x112   : > { %v435_v56 = vadd.f32 %v433_v55, %v136_v54 }
 0x114   : > { %v542_v57 = vmul.f32 -1.442695, %v435_v56  ;;  %v443_v58 = vrot.slane %v435_v56, 2  ;;  %v454_v60 = vrot.slane %v435_v56, 6  ;;  %v451_v63 = vrot.slane %v435_v56, 4 }
 0x116   : > { %608 = vpow2.f32 %v542_v57  ;;  %v543_v59 = vmul.f32 -1.442695, %v443_v58  ;;  %v544_v61 = vmul.f32 -1.442695, %v454_v60 }
 0x118   : > { %610 = vpow2.f32 %v543_v59 }
 0x119   : > { %612 = vpow2.f32 %v544_v61 }
 0x120   : > { %v609_v62 = vpop.eup %608 }
 0x121   : > { %v439_v0 = vadd.f32 1.0, %v609_v62 }
 0x122   : > { %v611_v1 = vpop.eup %610 }
 0x123   : > { %614 = vrcp.f32 %v439_v0  ;;  %v448_v2 = vadd.f32 1.0, %v611_v1  ;;  %v613_v3 = vpop.eup %612 }
 0x124   : > { %616 = vtanh.f32 %v451_v63  ;;  %v459_v8 = vadd.f32 1.0, %v613_v3 }
 0x125   : > { %618 = vrcp.f32 %v448_v2 }
 0x126   : > { %620 = vrcp.f32 %v459_v8 }
 0x12d   : > { %v615_v4 = vpop.eup %614 }
 0x12e   : > { %v617_v6 = vpop.eup %616 }
 0x12f   : > { %v619_v7 = vpop.eup %618  ;;  %v464_v10 = vmul.f32 %v617_v6, %v615_v4 }
 0x130   : > { %v463_v9 = vmul.f32 %v619_v7, %v462_v5  ;;  %v621_v12 = vpop.eup %620 }
 0x132   : > { %v465_v11 = vadd.f32 %v464_v10, %v463_v9 }
 0x134   : > { %622 = vtanh.f32 %v465_v11  ;;  %468 = vst [vmem:[#allocation3] sm:$0x3] %v465_v11 }
 0x13b   : > { %473 = sbr.rel (%p545_p5) target bundleno = 322 (0x142), region = 36 }
 0x13e   : > { %v623_v13 = vpop.eup %622 }
 0x13f   : > { %v467_v14 = vmul.f32 %v623_v13, %v621_v12 }
 0x141   : > { %469 = vst [vmem:[#allocation2] sm:$0x3] %v467_v14  ;;  %474 = vst [vmem:[%s774_s2] sm:$0x3] (!%p545_p5), %v467_v14 }
 0x142 PF: > { %s12_s9 = sadd.s32 1, %s630_s9  }
 0x143   : > { %p9_p6 = scmp.ge.s32.totalorder %s12_s9, 4  }
 0x145   :  { %11 = sbr.rel (!%p9_p6) target bundleno = 1 (0x1), region = 62 }

// kernel: forward.12
= control target key start
LH: loop header
LB: loop body
LE: loop exit
PB: predicated region body
PF: predicated region fallthrough
CT: control target
= control target key end

     0   :  { %vm1472_vm0 = vmmov 0   ;;  %s1833_s1 = inlined_call_operand.vmem [shape: bf16[1152,128], index: 1, kind: input, shape index: {}]   ;;  %s1834_s0 = inlined_call_operand.vmem [shape: bf16[48,1152], index: 0, kind: input, shape index: {}]   ;;  %s1835_s2 = inlined_call_operand.vmem [shape: f32[1,128], index: 2, kind: input, shape index: {}]   ;;  %s1836_s3 = inlined_call_operand.vmem [shape: f32[48,128], index: 3, kind: output, shape index: {}]  }
   0x1   :  { %v1360_v0 = vld [vmem:[%s1833_s1 + $0x40] sm:$0xff]   ;;  %v1364_v4 = vld [vmem:[%s1833_s1 + $0x48] sm:$0xff]   ;;  %v1368_v8 = vld [vmem:[%s1833_s1 + $0x50] sm:$0xff]  }
   0x2   :  { %v1361_v1 = vld [vmem:[%s1833_s1 + $0xc0] sm:$0xff]   ;;  %1167 = vmatprep.subr.bf16.mxu0 %v1360_v0  ;;  %v1365_v5 = vld [vmem:[%s1833_s1 + $0xc8] sm:$0xff]   ;;  %v1369_v9 = vld [vmem:[%s1833_s1 + $0xd0] sm:$0xff]  }
   0x3   :  { %v1362_v2 = vld [vmem:[%s1833_s1] sm:$0xff]   ;;  %1201 = vmatprep.subr.bf16.mxu1 %v1361_v1  ;;  %v1366_v6 = vld [vmem:[%s1833_s1 + $0x8] sm:$0xff]   ;;  %v1370_v10 = vld [vmem:[%s1833_s1 + $0x10] sm:$0xff]  }
   0x4   :  { %v1363_v3 = vld [vmem:[%s1833_s1 + $0x80] sm:$0xff]   ;;  %1168 = vmatpush3.bf16.msra.mxu0 %v1362_v2  ;;  %v1367_v7 = vld [vmem:[%s1833_s1 + $0x88] sm:$0xff]   ;;  %v1371_v11 = vld [vmem:[%s1833_s1 + $0x90] sm:$0xff]  }
   0x5   :  { %1202 = vmatpush3.bf16.msra.mxu1 %v1363_v3  ;;  %1169 = vmatprep.subr.bf16.mxu0 %v1364_v4  ;;  %v1372_v12 = vld [vmem:[%s1833_s1 + $0x58] sm:$0xff]   ;;  %v1376_v16 = vld [vmem:[%s1833_s1 + $0x60] sm:$0xff]   ;;  %v1380_v20 = vld [vmem:[%s1833_s1 + $0x68] sm:$0xff]  }
   0x6   :  { %1203 = vmatprep.subr.bf16.mxu1 %v1365_v5  ;;  %v1373_v13 = vld [vmem:[%s1833_s1 + $0xd8] sm:$0xff]   ;;  %v1377_v17 = vld [vmem:[%s1833_s1 + $0xe0] sm:$0xff]   ;;  %v1381_v21 = vld [vmem:[%s1833_s1 + $0xe8] sm:$0xff]  }
   0x7   :  { %v1374_v14 = vld [vmem:[%s1833_s1 + $0x18] sm:$0xff]   ;;  %v1378_v18 = vld [vmem:[%s1833_s1 + $0x20] sm:$0xff]   ;;  %v1382_v22 = vld [vmem:[%s1833_s1 + $0x28] sm:$0xff]  }
   0x8   :  { %1170 = vmatpush3.bf16.msra.mxu0 %v1366_v6  ;;  %v1375_v15 = vld [vmem:[%s1833_s1 + $0x98] sm:$0xff]   ;;  %v1379_v19 = vld [vmem:[%s1833_s1 + $0xa0] sm:$0xff]   ;;  %v1383_v23 = vld [vmem:[%s1833_s1 + $0xa8] sm:$0xff]  }
   0x9   :  { %1204 = vmatpush3.bf16.msra.mxu1 %v1367_v7  ;;  %1171 = vmatprep.subr.bf16.mxu0 %v1368_v8  ;;  %v1384_v24 = vld [vmem:[%s1833_s1 + $0x70] sm:$0xff]   ;;  %v1388_v28 = vld [vmem:[%s1833_s1 + $0x78] sm:$0xff]   ;;  %v1392_v32 = vld [vmem:[%s1834_s0] ss:$36 sps:$4 sm:$0xff]  }
   0xa   :  { %1205 = vmatprep.subr.bf16.mxu1 %v1369_v9  ;;  %v1385_v25 = vld [vmem:[%s1833_s1 + $0xf0] sm:$0xff]   ;;  %v1389_v29 = vld [vmem:[%s1833_s1 + $0xf8] sm:$0xff]   ;;  %v1394_v33 = vld [vmem:[%s1834_s0 + $0x4] ss:$36 sps:$4 sm:$0xff]  }
   0xb   :  { %v1386_v26 = vld [vmem:[%s1833_s1 + $0x30] sm:$0xff]   ;;  %v1390_v30 = vld [vmem:[%s1833_s1 + $0x38] sm:$0xff]   ;;  %v1395_v34 = vld [vmem:[%s1834_s0 + $0x8] ss:$36 sps:$4 sm:$0xff]   ;;  %798 = vmatprep.mubr.bf16.mxu0 %v1394_v33 }
   0xc   :  { %1172 = vmatpush3.bf16.msra.mxu0 %v1370_v10  ;;  %v1387_v27 = vld [vmem:[%s1833_s1 + $0xb0] sm:$0xff]   ;;  %v1391_v31 = vld [vmem:[%s1833_s1 + $0xb8] sm:$0xff]   ;;  %v1398_v36 = vld [vmem:[%s1833_s1 + $0x140] sm:$0xff]  }
   0xd   :  { %1206 = vmatpush3.bf16.msra.mxu1 %v1371_v11  ;;  %1173 = vmatprep.subr.bf16.mxu0 %v1372_v12  ;;  %v1397_v35 = vld [vmem:[%s1834_s0 + $0xc] ss:$36 sps:$4 sm:$0xff]   ;;  %v1399_v37 = vld [vmem:[%s1833_s1 + $0x1c0] sm:$0xff]   ;;  %v1413_v50 = vld [vmem:[%s1833_s1 + $0x158] sm:$0xff]  }
   0xe   :  { %1207 = vmatprep.subr.bf16.mxu1 %v1373_v13  ;;  %855 = vmatprep.mubr.bf16.mxu1 %v1397_v35  ;;  %v1400_v38 = vld [vmem:[%s1833_s1 + $0x100] sm:$0xff]   ;;  %v1402_v40 = vld [vmem:[%s1833_s1 + $0x148] sm:$0xff]   ;;  %v1406_v44 = vld [vmem:[%s1833_s1 + $0x150] sm:$0xff]  }
   0xf   :  { %v1401_v39 = vld [vmem:[%s1833_s1 + $0x180] sm:$0xff]   ;;  %v1403_v41 = vld [vmem:[%s1833_s1 + $0x1c8] sm:$0xff]   ;;  %v1407_v45 = vld [vmem:[%s1833_s1 + $0x1d0] sm:$0xff]  }
  0x10   :  { %1174 = vmatpush3.bf16.msra.mxu0 %v1374_v14  ;;  %v1404_v42 = vld [vmem:[%s1833_s1 + $0x108] sm:$0xff]   ;;  %v1408_v46 = vld [vmem:[%s1833_s1 + $0x110] sm:$0xff]   ;;  %v1414_v51 = vld [vmem:[%s1833_s1 + $0x1d8] sm:$0xff]   ;;  %v1471_v14 = vmov 0.0  }
  0x11   :  { %1208 = vmatpush3.bf16.msra.mxu1 %v1375_v15  ;;  %1175 = vmatprep.subr.bf16.mxu0 %v1376_v16  ;;  %v1405_v43 = vld [vmem:[%s1833_s1 + $0x188] sm:$0xff]   ;;  %v1409_v47 = vld [vmem:[%s1833_s1 + $0x190] sm:$0xff]   ;;  %v1417_v53 = vld [vmem:[%s1833_s1 + $0x118] sm:$0xff]  }
  0x12   :  { %1209 = vmatprep.subr.bf16.mxu1 %v1377_v17  ;;  %v1410_v48 = vld [vmem:[%s1834_s0 + $0x4c] ss:$36 sps:$4 sm:$0xff]   ;;  %v1415_v52 = vld [vmem:[%s1834_s0 + $0x54] ss:$36 sps:$4 sm:$0xff]   ;;  %v1420_v56 = vld [vmem:[%s1833_s1 + $0x160] sm:$0xff]  }
  0x13   :  { %v1412_v49 = vld [vmem:[%s1834_s0 + $0x48] ss:$36 sps:$4 sm:$0xff]   ;;  %v1418_v54 = vld [vmem:[%s1833_s1 + $0x198] sm:$0xff]   ;;  %v1419_v55 = vld [vmem:[%s1834_s0 + $0x50] ss:$36 sps:$4 sm:$0xff]  }
  0x14   :  { %1176 = vmatpush3.bf16.msra.mxu0 %v1378_v18  ;;  %v1421_v57 = vld [vmem:[%s1833_s1 + $0x1e0] sm:$0xff]   ;;  %v1424_v60 = vld [vmem:[%s1834_s0 + $0x94] ss:$36 sps:$4 sm:$0xff]   ;;  %v1427_v62 = vld [vmem:[%s1833_s1 + $0x168] sm:$0xff]  }
  0x15   :  { %1210 = vmatpush3.bf16.msra.mxu1 %v1379_v19  ;;  %1177 = vmatprep.subr.bf16.mxu0 %v1380_v20  ;;  %v1422_v58 = vld [vmem:[%s1833_s1 + $0x120] sm:$0xff]   ;;  %v1426_v61 = vld [vmem:[%s1834_s0 + $0x90] ss:$36 sps:$4 sm:$0xff]   ;;  %v1428_v63 = vld [vmem:[%s1833_s1 + $0x1e8] sm:$0xff]  }
  0x16   :  { %1211 = vmatprep.subr.bf16.mxu1 %v1381_v21  ;;  %v1423_v59 = vld [vmem:[%s1833_s1 + $0x1a0] sm:$0xff]   ;;  %v1431_v1 = vld [vmem:[%s1833_s1 + $0x128] sm:$0xff]   ;;  %v1433_v3 = vld [vmem:[%s1834_s0 + $0x98] ss:$36 sps:$4 sm:$0xff]  }
  0x17   :  { %v1429_v0 = vld [vmem:[%s1834_s0 + $0x9c] ss:$36 sps:$4 sm:$0xff]   ;;  %v1432_v2 = vld [vmem:[%s1833_s1 + $0x1a8] sm:$0xff]   ;;  %v1434_v4 = vld [vmem:[%s1833_s1 + $0x170] sm:$0xff]  }
  0x18   :  { %1178 = vmatpush3.bf16.msra.mxu0 %v1382_v22  ;;  %v1435_v5 = vld [vmem:[%s1833_s1 + $0x1f0] sm:$0xff]   ;;  %v1438_v8 = vld [vmem:[%s1833_s1 + $0x178] sm:$0xff]   ;;  %v1448_v17 = vld [vmem:[%s1833_s1 + $0x200] sm:$0xff]  }
  0x19   :  { %1212 = vmatpush3.bf16.msra.mxu1 %v1383_v23  ;;  %1179 = vmatprep.subr.bf16.mxu0 %v1384_v24  ;;  %v1436_v6 = vld [vmem:[%s1833_s1 + $0x130] sm:$0xff]   ;;  %v1439_v9 = vld [vmem:[%s1833_s1 + $0x1f8] sm:$0xff]   ;;  %v1449_v18 = vld [vmem:[%s1833_s1 + $0x208] sm:$0xff]  }
  0x1a   :  { %1213 = vmatprep.subr.bf16.mxu1 %v1385_v25  ;;  %v1437_v7 = vld [vmem:[%s1833_s1 + $0x1b0] sm:$0xff]   ;;  %v1440_v10 = vld [vmem:[%s1833_s1 + $0x138] sm:$0xff]   ;;  %v1453_v20 = vld [vmem:[%s1834_s0 + $0x64] ss:$36 sps:$4 sm:$0xff]  }
  0x1b   :  { %v1441_v11 = vld [vmem:[%s1833_s1 + $0x1b8] sm:$0xff]   ;;  %v1442_v12 = vld [vmem:[%s1834_s0 + $0x10] ss:$36 sps:$4 sm:$0xff]   ;;  %v1456_v23 = vld [vmem:[%s1834_s0 + $0x60] ss:$36 sps:$4 sm:$0xff]  }
  0x1c   :  { %1180 = vmatpush3.bf16.msra.mxu0 %v1386_v26  ;;  %v1444_v13 = vld [vmem:[%s1834_s0 + $0x14] ss:$36 sps:$4 sm:$0xff]   ;;  %v1447_v16 = vld [vmem:[%s1834_s0 + $0x1c] ss:$36 sps:$4 sm:$0xff]   ;;  %v1458_v24 = vld [vmem:[%s1834_s0 + $0xa4] ss:$36 sps:$4 sm:$0xff]  }
  0x1d   :  { %1214 = vmatpush3.bf16.msra.mxu1 %v1387_v27  ;;  %1181 = vmatprep.subr.bf16.mxu0 %v1388_v28  ;;  %v1445_v15 = vld [vmem:[%s1834_s0 + $0x18] ss:$36 sps:$4 sm:$0xff]   ;;  %v1455_v22 = vld [vmem:[%s1833_s1 + $0x210] sm:$0xff]   ;;  %v1460_v27 = vld [vmem:[%s1834_s0 + $0xa0] ss:$36 sps:$4 sm:$0xff]  }
  0x1e   :  { %1215 = vmatprep.subr.bf16.mxu1 %v1389_v29  ;;  %v1450_v19 = vld [vmem:[%s1834_s0 + $0x5c] ss:$36 sps:$4 sm:$0xff]   ;;  %v1461_v25 = vld [vmem:[%s1834_s0 + $0xac] ss:$36 sps:$4 sm:$0xff]  }
  0x1f   :  { %v1452_v21 = vld [vmem:[%s1834_s0 + $0x58] ss:$36 sps:$4 sm:$0xff]   ;;  %v1463_v28 = vld [vmem:[%s1833_s1 + $0x220] sm:$0xff]   ;;  %v1464_v29 = vld [vmem:[%s1834_s0 + $0xa8] ss:$36 sps:$4 sm:$0xff]  }
  0x20   :  { %1182 = vmatpush3.bf16.msra.mxu0 %v1390_v30  ;;  %v1457_v26 = vld [vmem:[%s1833_s1 + $0x218] sm:$0xff]   ;;  %v1465_v30 = vld [vmem:[%s1833_s1 + $0x228] sm:$0xff]   ;;  %v1468_v33 = vld [vmem:[%s1834_s0 + $0x20] ss:$36 sps:$4 sm:$0xff]  }
  0x21   :  { %1216 = vmatpush3.bf16.msra.mxu1 %v1391_v31  ;;  %1235 = vmatprep.subr.bf16.mxu0 %v1398_v36  ;;  %v1466_v31 = vld [vmem:[%s1833_s1 + $0x230] sm:$0xff]  }
  0x22   :  { %1269 = vmatprep.subr.bf16.mxu1 %v1399_v37  ;;  %v1470_v35 = vld [vmem:[%s1834_s0 + $0xb0] ss:$36 sps:$4 sm:$0xff]  }
  0x23   :  { %799 = vmatmul.mubr.bf16.vlgmr.msra.gmra.mrb[0].mxu0 %v1392_v32  ;;  %v1467_v32 = vld [vmem:[%s1833_s1 + $0x238] sm:$0xff]  }
  0x24   :  { %856 = vmatmul.mubr.bf16.vlgmr.msra.gmra.mrb[0].mxu1 %v1395_v34  ;;  %1236 = vmatpush3.bf16.msra.mxu0 %v1400_v38  ;;  %v1469_v34 = vld [vmem:[%s1834_s0 + $0x68] ss:$36 sps:$4 sm:$0xff]   ;;  %v1067_v38 = vld [vmem:[%s1835_s2] ss:$0 sm:$0xff] }
  0x25   :  { %1270 = vmatpush3.bf16.msra.mxu1 %v1401_v39  ;;  %1237 = vmatprep.subr.bf16.mxu0 %v1402_v40 }
  0x26   :  { %1271 = vmatprep.subr.bf16.mxu1 %v1403_v41  ;;  %806 = vmatprep.mubr.bf16.mxu0 %v1410_v48 }
  0x27   :  { %863 = vmatprep.mubr.bf16.mxu1 %v1415_v52 }
  0x28   :  { %1238 = vmatpush3.bf16.msra.mxu0 %v1404_v42 }
  0x29   :  { %1272 = vmatpush3.bf16.msra.mxu1 %v1405_v43  ;;  %1239 = vmatprep.subr.bf16.mxu0 %v1406_v44 }
  0x2a   :  { %1273 = vmatprep.subr.bf16.mxu1 %v1407_v45 }
  0x2b   :  { %807 = vmatmul.mubr.bf16.gmra.mrb[4].mxu0 %v1412_v49 }
  0x2c   :  { %1240 = vmatpush3.bf16.msra.mxu0 %v1408_v46  ;;  %864 = vmatmul.mubr.bf16.gmra.mrb[4].mxu1 %v1419_v55 }
  0x2d   :  { %1274 = vmatpush3.bf16.msra.mxu1 %v1409_v47  ;;  %1241 = vmatprep.subr.bf16.mxu0 %v1413_v50 }
  0x2e   :  { %1275 = vmatprep.subr.bf16.mxu1 %v1414_v51  ;;  %814 = vmatprep.mubr.bf16.mxu0 %v1424_v60 }
  0x2f   :  { %871 = vmatprep.mubr.bf16.mxu1 %v1429_v0 }
  0x30   :  { %1242 = vmatpush3.bf16.msra.mxu0 %v1417_v53 }
  0x31   :  { %1276 = vmatpush3.bf16.msra.mxu1 %v1418_v54  ;;  %1243 = vmatprep.subr.bf16.mxu0 %v1420_v56 }
  0x32   :  { %1277 = vmatprep.subr.bf16.mxu1 %v1421_v57 }
  0x33   :  { %815 = vmatmul.mubr.bf16.gmra.mrb[8].mxu0 %v1426_v61 }
  0x34   :  { %1244 = vmatpush3.bf16.msra.mxu0 %v1422_v58  ;;  %872 = vmatmul.mubr.bf16.gmra.mrb[8].mxu1 %v1433_v3 }
  0x35   :  { %1278 = vmatpush3.bf16.msra.mxu1 %v1423_v59  ;;  %1245 = vmatprep.subr.bf16.mxu0 %v1427_v62 }
  0x36   :  { %1279 = vmatprep.subr.bf16.mxu1 %v1428_v63  ;;  %912 = vmatprep.mubr.bf16.mxu0 %v1444_v13 }
  0x37   :  { %969 = vmatprep.mubr.bf16.mxu1 %v1447_v16 }
  0x38   :  { %1246 = vmatpush3.bf16.msra.mxu0 %v1431_v1 }
  0x39   :  { %1280 = vmatpush3.bf16.msra.mxu1 %v1432_v2  ;;  %1247 = vmatprep.subr.bf16.mxu0 %v1434_v4 }
  0x3a   :  { %1281 = vmatprep.subr.bf16.mxu1 %v1435_v5 }
  0x3c   :  { %1248 = vmatpush3.bf16.msra.mxu0 %v1436_v6 }
  0x3d   :  { %1282 = vmatpush3.bf16.msra.mxu1 %v1437_v7  ;;  %1249 = vmatprep.subr.bf16.mxu0 %v1438_v8 }
  0x3e   :  { %1283 = vmatprep.subr.bf16.mxu1 %v1439_v9 }
  0x40   :  { %1250 = vmatpush3.bf16.msra.mxu0 %v1440_v10 }
  0x41   :  { %1284 = vmatpush3.bf16.msra.mxu1 %v1441_v11  ;;  %1314 = vmatprep.subr.bf16.mxu0 %v1471_v14 }
  0x42   :  { %1342 = vmatprep.subr.bf16.mxu1 %v1471_v14 }
  0x43   :  { %913 = vmatmul.mubr.bf16.vlgmr.msra.gmra.mrb[12].mxu0 %v1442_v12 }
  0x44   :  { %970 = vmatmul.mubr.bf16.vlgmr.msra.gmra.mrb[12].mxu1 %v1445_v15  ;;  %1315 = vmatpush3.bf16.msra.mxu0 %v1448_v17 }
  0x45   :  { %1350 = vmatpush3.bf16.msra.mxu1 %v1448_v17  ;;  %1316 = vmatprep.subr.bf16.mxu0 %v1471_v14 }
  0x46   :  { %1343 = vmatprep.subr.bf16.mxu1 %v1471_v14  ;;  %920 = vmatprep.mubr.bf16.mxu0 %v1450_v19 }
  0x47   :  { %977 = vmatprep.mubr.bf16.mxu1 %v1453_v20 }
  0x48   :  { %1317 = vmatpush3.bf16.msra.mxu0 %v1449_v18 }
  0x49   :  { %1351 = vmatpush3.bf16.msra.mxu1 %v1449_v18  ;;  %1318 = vmatprep.subr.bf16.mxu0 %v1471_v14 }
  0x4a   :  { %1344 = vmatprep.subr.bf16.mxu1 %v1471_v14 }
  0x4b   :  { %921 = vmatmul.mubr.bf16.gmra.mrb[16].mxu0 %v1452_v21 }
  0x4c   :  { %1319 = vmatpush3.bf16.msra.mxu0 %v1455_v22  ;;  %978 = vmatmul.mubr.bf16.gmra.mrb[16].mxu1 %v1456_v23 }
  0x4d   :  { %1352 = vmatpush3.bf16.msra.mxu1 %v1455_v22  ;;  %1320 = vmatprep.subr.bf16.mxu0 %v1471_v14 }
  0x4e   :  { %1345 = vmatprep.subr.bf16.mxu1 %v1471_v14  ;;  %928 = vmatprep.mubr.bf16.mxu0 %v1458_v24 }
  0x4f   :  { %985 = vmatprep.mubr.bf16.mxu1 %v1461_v25 }
  0x50   :  { %1321 = vmatpush3.bf16.msra.mxu0 %v1457_v26 }
  0x51   :  { %1353 = vmatpush3.bf16.msra.mxu1 %v1457_v26  ;;  %1322 = vmatprep.subr.bf16.mxu0 %v1471_v14 }
  0x52   :  { %1346 = vmatprep.subr.bf16.mxu1 %v1471_v14 }
  0x53   :  { %929 = vmatmul.mubr.bf16.gmra.mrb[20].mxu0 %v1460_v27 }
  0x54   :  { %1323 = vmatpush3.bf16.msra.mxu0 %v1463_v28  ;;  %986 = vmatmul.mubr.bf16.gmra.mrb[20].mxu1 %v1464_v29 }
  0x55   :  { %1354 = vmatpush3.bf16.msra.mxu1 %v1463_v28  ;;  %1324 = vmatprep.subr.bf16.mxu0 %v1471_v14 }
  0x56   :  { %1347 = vmatprep.subr.bf16.mxu1 %v1471_v14  ;;  %1330 = vmatprep.mubr.msk.bf16.mxu0 %vm1472_vm0, %v1471_v14 }
  0x57   :  { %1334 = vmatprep.mubr.msk.bf16.mxu1 %vm1472_vm0, %v1471_v14 }
  0x58   :  { %1325 = vmatpush3.bf16.msra.mxu0 %v1465_v30 }
  0x59   :  { %1355 = vmatpush3.bf16.msra.mxu1 %v1465_v30  ;;  %1326 = vmatprep.subr.bf16.mxu0 %v1471_v14 }
  0x5a   :  { %1348 = vmatprep.subr.bf16.mxu1 %v1471_v14 }
  0x5c   :  { %1327 = vmatpush3.bf16.msra.mxu0 %v1466_v31 }
  0x5d   :  { %1356 = vmatpush3.bf16.msra.mxu1 %v1466_v31  ;;  %1328 = vmatprep.subr.bf16.mxu0 %v1471_v14 }
  0x5e   :  { %1349 = vmatprep.subr.bf16.mxu1 %v1471_v14 }
  0x60   :  { %1329 = vmatpush3.bf16.msra.mxu0 %v1467_v32 }
  0x61   :  { %1357 = vmatpush3.bf16.msra.mxu1 %v1467_v32 }
  0x63   :  { %1331 = vmatmul.mubr.bf16.vlgmr.msra.gmra.mrb[24].mxu0 %v1468_v33 }
  0x64   :  { %1335 = vmatmul.mubr.bf16.vlgmr.msra.gmra.mrb[24].mxu1 %v1469_v34 }
  0x65   :  { %1338 = vmatprep.mubr.msk.bf16.mxu1 %vm1472_vm0, %v1471_v14 }
  0x6c   :  { %1339 = vmatmul.mubr.bf16.gmra.mrb[28].mxu1 %v1470_v35 }
  0xf6   :  { %v1183_v36 = vpop.f32.mrb[0].mxu0 }
  0xf7   :  { %v1217_v37 = vpop.f32.mrb[0].mxu1  ;;  %v1184_v39 = vpop.f32.mrb[1].mxu0 }
  0xf8   :  { %v1185_v40 = vadd.f32 %v1184_v39, %v1183_v36  ;;  %v1218_v41 = vpop.f32.mrb[1].mxu1  ;;  %v1186_v42 = vpop.f32.mrb[2].mxu0 }
  0xf9   :  { %v1219_v43 = vadd.f32 %v1218_v41, %v1217_v37  ;;  %v1220_v44 = vpop.f32.mrb[2].mxu1  ;;  %v1187_v45 = vpop.f32.mrb[3].mxu0 }
  0xfa   :  { %v801_v46 = vadd.f32 %v1185_v40, %v1067_v38  ;;  %v1188_v47 = vadd.f32 %v1187_v45, %v1186_v42  ;;  %v1221_v48 = vpop.f32.mrb[3].mxu1 }
  0xfb   :  { %v1222_v49 = vadd.f32 %v1221_v48, %v1220_v44 }
  0xfc   :  { %v858_v50 = vadd.f32 %v1219_v43, %v801_v46  ;;  %v804_v51 = vadd.f32 %v1188_v47, %v1067_v38 }
  0xfe   :  { %v861_v52 = vadd.f32 %v1222_v49, %v804_v51  ;;  %v1189_v53 = vpop.f32.mrb[4].mxu0 }
  0xff   :  { %v1190_v54 = vpop.f32.mrb[5].mxu0  ;;  %v1223_v60 = vpop.f32.mrb[4].mxu1 }
 0x100   :  { %v1191_v55 = vadd.f32 %v1190_v54, %v1189_v53  ;;  %v1192_v56 = vpop.f32.mrb[6].mxu0  ;;  %v1224_v61 = vpop.f32.mrb[5].mxu1 }
 0x101   :  { %v1193_v57 = vpop.f32.mrb[7].mxu0  ;;  %v1225_v63 = vadd.f32 %v1224_v61, %v1223_v60  ;;  %v1226_v0 = vpop.f32.mrb[6].mxu1 }
 0x102   :  { %v1194_v58 = vadd.f32 %v1193_v57, %v1192_v56  ;;  %v809_v59 = vadd.f32 %v1191_v55, %v1067_v38  ;;  %v1227_v1 = vpop.f32.mrb[7].mxu1 }
 0x103   :  { %v1228_v3 = vadd.f32 %v1227_v1, %v1226_v0 }
 0x104   :  { %v812_v62 = vadd.f32 %v1194_v58, %v1067_v38  ;;  %v866_v2 = vadd.f32 %v1225_v63, %v809_v59 }
 0x106   :  { %v869_v4 = vadd.f32 %v1228_v3, %v812_v62  ;;  %v1195_v5 = vpop.f32.mrb[8].mxu0 }
 0x107   :  { %v1196_v6 = vpop.f32.mrb[9].mxu0  ;;  %v1229_v12 = vpop.f32.mrb[8].mxu1 }
 0x108   :  { %v1197_v7 = vadd.f32 %v1196_v6, %v1195_v5  ;;  %v1198_v8 = vpop.f32.mrb[10].mxu0  ;;  %v1230_v13 = vpop.f32.mrb[9].mxu1 }
 0x109   :  { %v1199_v9 = vpop.f32.mrb[11].mxu0  ;;  %v1231_v15 = vadd.f32 %v1230_v13, %v1229_v12  ;;  %v1232_v16 = vpop.f32.mrb[10].mxu1 }
 0x10a   :  { %v1200_v10 = vadd.f32 %v1199_v9, %v1198_v8  ;;  %v817_v11 = vadd.f32 %v1197_v7, %v1067_v38  ;;  %v1233_v17 = vpop.f32.mrb[11].mxu1 }
 0x10b   :  { %v1234_v19 = vadd.f32 %v1233_v17, %v1232_v16 }
 0x10c   :  { %v820_v14 = vadd.f32 %v1200_v10, %v1067_v38  ;;  %v874_v18 = vadd.f32 %v1231_v15, %v817_v11 }
 0x10e   :  { %v877_v20 = vadd.f32 %v1234_v19, %v820_v14 }
 0x116   :  { %v1251_v21 = vpop.f32.mrb[12].mxu0 }
 0x117   :  { %v1285_v22 = vpop.f32.mrb[12].mxu1  ;;  %v1252_v23 = vpop.f32.mrb[13].mxu0 }
 0x118   :  { %v1253_v24 = vadd.f32 %v1252_v23, %v1251_v21  ;;  %v1286_v25 = vpop.f32.mrb[13].mxu1  ;;  %v1254_v26 = vpop.f32.mrb[14].mxu0 }
 0x119   :  { %v1287_v27 = vadd.f32 %v1286_v25, %v1285_v22  ;;  %v1288_v28 = vpop.f32.mrb[14].mxu1  ;;  %v1255_v29 = vpop.f32.mrb[15].mxu0 }
 0x11a   :  { %v915_v30 = vadd.f32 %v1253_v24, %v858_v50  ;;  %v1256_v31 = vadd.f32 %v1255_v29, %v1254_v26  ;;  %v1289_v32 = vpop.f32.mrb[15].mxu1 }
 0x11b   :  { %v1290_v33 = vadd.f32 %v1289_v32, %v1288_v28 }
 0x11c   :  { %v918_v34 = vadd.f32 %v1256_v31, %v861_v52  ;;  %v972_v35 = vadd.f32 %v1287_v27, %v915_v30 }
 0x11e   :  { %v1257_v36 = vpop.f32.mrb[16].mxu0  ;;  %v975_v37 = vadd.f32 %v1290_v33, %v918_v34 }
 0x11f   :  { %v1258_v38 = vpop.f32.mrb[17].mxu0  ;;  %v1291_v39 = vpop.f32.mrb[16].mxu1 }
 0x120   :  { %v1259_v40 = vadd.f32 %v1258_v38, %v1257_v36  ;;  %v1260_v41 = vpop.f32.mrb[18].mxu0  ;;  %v1292_v42 = vpop.f32.mrb[17].mxu1 }
 0x121   :  { %v1261_v43 = vpop.f32.mrb[19].mxu0  ;;  %v1293_v44 = vadd.f32 %v1292_v42, %v1291_v39  ;;  %v1294_v45 = vpop.f32.mrb[18].mxu1 }
 0x122   :  { %v923_v46 = vadd.f32 %v1259_v40, %v866_v2  ;;  %v1262_v47 = vadd.f32 %v1261_v43, %v1260_v41  ;;  %v1295_v48 = vpop.f32.mrb[19].mxu1 }
 0x123   :  { %v1296_v49 = vadd.f32 %v1295_v48, %v1294_v45 }
 0x124   :  { %v926_v50 = vadd.f32 %v1262_v47, %v869_v4  ;;  %v980_v51 = vadd.f32 %v1293_v44, %v923_v46 }
 0x126   :  { %v1263_v53 = vpop.f32.mrb[20].mxu0  ;;  %v983_v54 = vadd.f32 %v1296_v49, %v926_v50 }
 0x127   :  { %v1264_v52 = vpop.f32.mrb[21].mxu0  ;;  %v1297_v55 = vpop.f32.mrb[20].mxu1 }
 0x128   :  { %v1265_v56 = vadd.f32 %v1264_v52, %v1263_v53  ;;  %v1266_v57 = vpop.f32.mrb[22].mxu0  ;;  %v1298_v58 = vpop.f32.mrb[21].mxu1 }
 0x129   :  { %v1267_v59 = vpop.f32.mrb[23].mxu0  ;;  %v1299_v60 = vadd.f32 %v1298_v58, %v1297_v55  ;;  %v1300_v61 = vpop.f32.mrb[22].mxu1 }
 0x12a   :  { %v931_v62 = vadd.f32 %v1265_v56, %v874_v18  ;;  %v1268_v63 = vadd.f32 %v1267_v59, %v1266_v57  ;;  %v1301_v0 = vpop.f32.mrb[23].mxu1 }
 0x12b   :  { %v1302_v1 = vadd.f32 %v1301_v0, %v1300_v61 }
 0x12c   :  { %v934_v2 = vadd.f32 %v1268_v63, %v877_v20  ;;  %v988_v3 = vadd.f32 %v1299_v60, %v931_v62 }
 0x12e   :  { %v991_v5 = vadd.f32 %v1302_v1, %v934_v2 }
 0x136   :  { %v1028_v6 = vpop.f32.mrb[24].mxu0 }
 0x137   :  { %v1029_v4 = vadd.f32 %v1028_v6, %v972_v35  ;;  %v1036_v7 = vpop.f32.mrb[24].mxu1  ;;  %v1332_v8 = vpop.f32.mrb[25].mxu0 }
 0x138   :  { %v1037_v9 = vadd.f32 %v1036_v7, %v980_v51  ;;  %v1336_v10 = vpop.f32.mrb[25].mxu1  ;;  %v1031_v11 = vpop.f32.mrb[26].mxu0 }
 0x139   :  { %v1051_v12 = vmax.f32 %v1029_v4, 0.0  ;;  %v1032_v13 = vadd.f32 %v1031_v11, %v975_v37  ;;  %v1039_v14 = vpop.f32.mrb[26].mxu1  ;;  %v1333_v15 = vpop.f32.mrb[27].mxu0 }
 0x13a   :  { %v1053_v16 = vmax.f32 %v1037_v9, 0.0  ;;  %v1040_v17 = vadd.f32 %v1039_v14, %v983_v54  ;;  %v1337_v18 = vpop.f32.mrb[27].mxu1 }
 0x13b   :  { %1057 = vst [vmem:[%s1836_s3] sm:$0xff] %v1051_v12  ;;  %v1052_v19 = vmax.f32 %v1032_v13, 0.0 }
 0x13c   :  { %1059 = vst [vmem:[%s1836_s3 + $0x10] sm:$0xff] %v1053_v16  ;;  %v1054_v20 = vmax.f32 %v1040_v17, 0.0 }
 0x13d   :  { %1058 = vst [vmem:[%s1836_s3 + $0x8] sm:$0xff] %v1052_v19 }
 0x13e   :  { %1060 = vst [vmem:[%s1836_s3 + $0x18] sm:$0xff] %v1054_v20 }
 0x13f   :  { %v1044_v21 = vpop.f32.mrb[28].mxu1 }
 0x140   :  { %v1045_v22 = vadd.f32 %v1044_v21, %v988_v3  ;;  %v1340_v23 = vpop.f32.mrb[29].mxu1 }
 0x141   :  { %v1047_v24 = vpop.f32.mrb[30].mxu1 }
 0x142   :  { %v1055_v25 = vmax.f32 %v1045_v22, 0.0  ;;  %v1048_v26 = vadd.f32 %v1047_v24, %v991_v5  ;;  %v1341_v27 = vpop.f32.mrb[31].mxu1 }
 0x144   :  { %1061 = vst [vmem:[%s1836_s3 + $0x20] sm:$0xff] %v1055_v25  ;;  %v1056_v28 = vmax.f32 %v1048_v26, 0.0 }
 0x146   :  { %1062 = vst [vmem:[%s1836_s3 + $0x28] sm:$0xff] %v1056_v28 }

</bundles_post_ra>
